<compile_context>
chip_gen: v5e
topology: v5e:2x2
jax: 0.10.0
libtpu: 0.0.40
codegen_flags: <defaults>
</compile_context>

<pallas_src>
import math

import numpy as np
import jax
import jax.numpy as jnp
from jax.experimental import pallas as pl
from jax.experimental.pallas import tpu as pltpu

# ---------------- model hyper-params (small, consistent with the module) ------------
B = 2      # batch
T = 8      # target sequence length
S = 8      # source (memory) sequence length
D = 32     # d_model ("size")
H = 4      # attention heads
DK = D // H
F = 64     # feed-forward hidden dim
EPS = 1e-6
SEG = 128  # lane-aligned segment width inside the packed weight slab


# -------------------------------- Pallas kernel -------------------------------------
def decoder_layer_kernel(x_ref, mem_ref, mask_ref, w_ref, w2_ref, p_ref, o_ref):
    BT = x_ref.shape[0]     # fused batch*target rows
    BS = mem_ref.shape[0]   # fused batch*source rows

    # ---- unpack slabs (static slices, loaded once) ----
    tmask = mask_ref[:, 0:BT]             # (BT, BT) block-diag additive mask
    smask = mask_ref[:, BT:BT + BS]       # (BT, BS) block-diag additive mask

    self_bqkv = p_ref[0:1, 0:3 * D]
    self_bo = p_ref[1:2, 0:D]
    src_bq = p_ref[2:3, 0:D]
    src_bkv = p_ref[3:4, 0:2 * D]
    src_bo = p_ref[4:5, 0:D]
    b1 = p_ref[5:6, 0:F]
    b2 = p_ref[6:7, 0:D]
    ln_g = [p_ref[7 + i:8 + i, 0:D] for i in range(3)]
    ln_b = [p_ref[10 + i:11 + i, 0:D] for i in range(3)]

    self_wqkv = w_ref[:, 0:3 * D]
    self_wo = w_ref[:, SEG:SEG + D]
    src_wq = w_ref[:, 2 * SEG:2 * SEG + D]
    src_wkv = w_ref[:, 3 * SEG:3 * SEG + 2 * D]
    src_wo = w_ref[:, 4 * SEG:4 * SEG + D]
    w1 = w_ref[:, 5 * SEG:5 * SEG + F]
    w2 = w2_ref[...]

    x = x_ref[...]        # (BT, D)
    mem = mem_ref[...]    # (BS, D)

    def layer_norm(v, g, b):
        mean = jnp.mean(v, axis=-1, keepdims=True)
        # unbiased std (torch.Tensor.std default), eps added to the std (not variance)
        var = jnp.sum((v - mean) ** 2, axis=-1, keepdims=True) * jnp.float32(1.0 / (D - 1))
        return g * (v - mean) / (jnp.sqrt(var) + jnp.float32(EPS)) + b

    def attend(q, k, v, add_mask, wo, bo):
        # q: (BT, D) with 1/sqrt(dk) folded into the Q projection
        # k, v: (Nk, D); add_mask: (BT, Nk) additive float (0 keep / -1e9 drop),
        # block-diagonal over the fused batch so cross-batch probs underflow to 0.
        heads = []
        for hh in range(H):                       # static unroll (tiny head dims)
            lo = hh * DK
            s = jax.lax.dot_general(q[:, lo:lo + DK], k[:, lo:lo + DK],
                                    (((1,), (1,)), ((), ())),
                                    preferred_element_type=jnp.float32)
            s = s + add_mask
            s = s - jnp.max(s, axis=-1, keepdims=True)
            p = jnp.exp(s)
            p = p / jnp.sum(p, axis=-1, keepdims=True)
            heads.append(jnp.dot(p, v[:, lo:lo + DK],
                                 preferred_element_type=jnp.float32))   # (BT, DK)
        hv = jnp.concatenate(heads, axis=-1)       # (BT, D) lane concat
        return jnp.dot(hv, wo, preferred_element_type=jnp.float32) + bo

    # --- sublayer 0: masked self-attention (fused QKV projection) ---
    xn = layer_norm(x, ln_g[0], ln_b[0])
    qkv = jnp.dot(xn, self_wqkv, preferred_element_type=jnp.float32) + self_bqkv
    x = x + attend(qkv[:, 0:D], qkv[:, D:2 * D], qkv[:, 2 * D:3 * D],
                   tmask, self_wo, self_bo)

    # --- sublayer 1: source attention (fused KV projection of raw memory) ---
    xn = layer_norm(x, ln_g[1], ln_b[1])
    q = jnp.dot(xn, src_wq, preferred_element_type=jnp.float32) + src_bq
    kv = jnp.dot(mem, src_wkv, preferred_element_type=jnp.float32) + src_bkv
    x = x + attend(q, kv[:, 0:D], kv[:, D:2 * D], smask, src_wo, src_bo)

    # --- sublayer 2: position-wise feed-forward ---
    xn = layer_norm(x, ln_g[2], ln_b[2])
    h1 = jnp.maximum(jnp.dot(xn, w1, preferred_element_type=jnp.float32) + b1,
                     jnp.float32(0.0))
    o_ref[...] = x + jnp.dot(h1, w2, preferred_element_type=jnp.float32) + b2


# -------------------------------- wrappers --------------------------------------------
def pack_params(params):
    """One-time packing: fuse QKV/KV weights, fold 1/sqrt(dk) into Q, build slabs."""
    (self_w, self_b, src_w, src_b, w1, b1, w2, b2, ln_g, ln_b) = params
    inv_sqrt_dk = 1.0 / math.sqrt(DK)

    self_wqkv = jnp.concatenate([self_w[0] * inv_sqrt_dk, self_w[1], self_w[2]], -1)
    self_bqkv = jnp.concatenate([self_b[0] * inv_sqrt_dk, self_b[1], self_b[2]], -1)
    src_wq = src_w[0] * inv_sqrt_dk
    src_bq = src_b[0] * inv_sqrt_dk
    src_wkv = jnp.concatenate([src_w[1], src_w[2]], -1)
    src_bkv = jnp.concatenate([src_b[1], src_b[2]], -1)

    assert 3 * D <= SEG and 2 * D <= SEG and F <= SEG

    # weight slab: segments start at 128-lane boundaries (zero padded)
    wslab = jnp.zeros((D, 6 * SEG), jnp.float32)
    for col, arr in ((0, self_wqkv), (SEG, self_w[3]), (2 * SEG, src_wq),
                     (3 * SEG, src_wkv), (4 * SEG, src_w[3]), (5 * SEG, w1)):
        wslab = wslab.at[:, col:col + arr.shape[1]].set(arr)

    # bias / LayerNorm slab: one padded 128-lane row per parameter vector
    rows = [self_bqkv, self_b[3], src_bq, src_bkv, src_b[3], b1, b2,
            ln_g[0], ln_g[1], ln_g[2], ln_b[0], ln_b[1], ln_b[2]]
    pslab = jnp.zeros((len(rows), SEG), jnp.float32)
    for r, v in enumerate(rows):
        v = v.reshape(1, -1)
        pslab = pslab.at[r:r + 1, 0:v.shape[-1]].set(v)

    return wslab, w2, pslab


def decoder_layer(x, memory, tgt_mask, src_mask, packed):
    """x: (B,T,D) f32, memory: (B,S,D) f32, tgt_mask: (B,T,T) i32, src_mask: (B,T,S) i32."""
    wslab, w2, pslab = packed
    Bx, Tx, Dx = x.shape
    Sx = memory.shape[1]
    BT, BS = Bx * Tx, Bx * Sx

    # Block-diagonal additive float masks over the fused batch (0 keep / -1e9 drop).
    neg = jnp.float32(-1e9)
    tadd = jnp.where(tgt_mask == 0, neg, jnp.float32(0.0))                 # (B,T,T)
    sadd = jnp.where(src_mask == 0, neg, jnp.float32(0.0))                 # (B,T,S)
    same = (jnp.arange(Bx)[:, None] == jnp.arange(Bx)[None, :])            # (B,B)
    tblk = jnp.where(same[:, None, :, None], tadd[:, :, None, :], neg).reshape(BT, BT)
    sblk = jnp.where(same[:, None, :, None], sadd[:, :, None, :], neg).reshape(BT, BS)
    mask_slab = jnp.concatenate([tblk, sblk], axis=-1)                     # (BT, BT+BS)

    x2 = x.reshape(BT, Dx)
    m2 = memory.reshape(BS, Dx)

    args = [x2, m2, mask_slab, wslab, w2, pslab]
    in_specs = [pl.BlockSpec(a.shape, lambda i, n=a.ndim: (0,) * n) for a in args]

    out = pl.pallas_call(
        decoder_layer_kernel,
        out_shape=jax.ShapeDtypeStruct((BT, Dx), jnp.float32),
        grid=(1,),
        in_specs=in_specs,
        out_specs=pl.BlockSpec((BT, Dx), lambda i: (0, 0)),
        compiler_params=pltpu.CompilerParams(
            dimension_semantics=("arbitrary",)),
    )(*args)
    return out.reshape(Bx, Tx, Dx)


decoder_layer = jax.jit(decoder_layer)


# ------------------------------ pure-JAX reference ------------------------------------
def _layer_norm_ref(v, g, b):
    mean = v.mean(-1, keepdims=True)
    var = ((v - mean) ** 2).sum(-1, keepdims=True) / (v.shape[-1] - 1)
    return g * (v - mean) / (jnp.sqrt(var) + EPS) + b


def _mha_ref(q_in, kv_in, mask, ws, bs):
    Bx, Tq, Dx = q_in.shape
    Skv = kv_in.shape[1]
    q = q_in @ ws[0] + bs[0]
    k = kv_in @ ws[1] + bs[1]
    v = kv_in @ ws[2] + bs[2]
    q = q.reshape(Bx, Tq, H, DK).transpose(0, 2, 1, 3)
    k = k.reshape(Bx, Skv, H, DK).transpose(0, 2, 1, 3)
    v = v.reshape(Bx, Skv, H, DK).transpose(0, 2, 1, 3)
    scores = jnp.einsum("bhqd,bhkd->bhqk", q, k) / math.sqrt(DK)
    scores = jnp.where(mask[:, None, :, :] == 0, -1e9, scores)
    p = jax.nn.softmax(scores, axis=-1)
    o = jnp.einsum("bhqk,bhkd->bhqd", p, v).transpose(0, 2, 1, 3).reshape(Bx, Tq, Dx)
    return o @ ws[3] + bs[3]


def decoder_layer_ref(x, memory, tgt_mask, src_mask, params):
    (self_w, self_b, src_w, src_b, w1, b1, w2, b2, ln_g, ln_b) = params
    xn = _layer_norm_ref(x, ln_g[0], ln_b[0])
    x = x + _mha_ref(xn, xn, tgt_mask, self_w, self_b)
    xn = _layer_norm_ref(x, ln_g[1], ln_b[1])
    x = x + _mha_ref(xn, memory, src_mask, src_w, src_b)
    xn = _layer_norm_ref(x, ln_g[2], ln_b[2])
    ff = jnp.maximum(xn @ w1 + b1, 0.0) @ w2 + b2
    return x + ff


# ------------------------------------ main ---------------------------------------------
if __name__ == "__main__":
    key = jax.random.PRNGKey(0)
    ks = jax.random.split(key, 10)
    scale = 0.1

    # parameters (deterministic, synthetic)
    self_w = jax.random.normal(ks[0], (4, D, D), jnp.float32) * scale   # Wq,Wk,Wv,Wo (in,out)
    self_b = jax.random.normal(ks[1], (4, 1, D), jnp.float32) * scale
    src_w = jax.random.normal(ks[2], (4, D, D), jnp.float32) * scale
    src_b = jax.random.normal(ks[3], (4, 1, D), jnp.float32) * scale
    w1 = jax.random.normal(ks[4], (D, F), jnp.float32) * scale
    b1 = jax.random.normal(ks[5], (1, F), jnp.float32) * scale
    w2 = jax.random.normal(ks[6], (F, D), jnp.float32) * scale
    b2 = jax.random.normal(ks[7], (1, D), jnp.float32) * scale
    ln_g = jnp.ones((3, 1, D), jnp.float32)    # a_2 init = ones
    ln_b = jnp.zeros((3, 1, D), jnp.float32)   # b_2 init = zeros
    params = (self_w, self_b, src_w, src_b, w1, b1, w2, b2, ln_g, ln_b)

    # inputs
    x = jax.random.normal(ks[8], (B, T, D), jnp.float32)
    memory = jax.random.normal(ks[9], (B, S, D), jnp.float32)
    # tgt_mask: causal subsequent mask, broadcast over batch
    tgt_mask = jnp.broadcast_to(
        jnp.tril(jnp.ones((T, T), jnp.int32)), (B, T, T)).astype(jnp.int32)
    # src_mask: padding-style mask (broadcast over query dim), mask last 2 src tokens of batch 1
    src_mask = jnp.ones((B, T, S), jnp.int32).at[1, :, S - 2:].set(0)

    packed = pack_params(params)   # one-time weight fusion / packing

    out = decoder_layer(x, memory, tgt_mask, src_mask, packed)
    out = jax.block_until_ready(out)

    ref = decoder_layer_ref(x, memory, tgt_mask, src_mask, params)
    np.testing.assert_allclose(np.asarray(out), np.asarray(ref), rtol=1e-3, atol=1e-3)

    print("KERNEL_OK")
</pallas_src>

<mosaic_0001>
module attributes {stable_mosaic.version = 11 : i64} {
  func.func @decoder_layer_kernel(%arg0: i32, %arg1: memref<16x32xf32, #tpu.memory_space<vmem>>, %arg2: memref<16x32xf32, #tpu.memory_space<vmem>>, %arg3: memref<16x32xf32, #tpu.memory_space<vmem>>, %arg4: memref<32x768xf32, #tpu.memory_space<vmem>>, %arg5: memref<64x32xf32, #tpu.memory_space<vmem>>, %arg6: memref<13x128xf32, #tpu.memory_space<vmem>>, %arg7: memref<16x32xf32, #tpu.memory_space<vmem>>) attributes {dimension_semantics = [#tpu.dimension_semantics<arbitrary>], iteration_bounds = array<i64: 1>, scalar_prefetch = 0 : i64, scratch_operands = 0 : i64, tpu.core_type = #tpu.core_type<tc>, window_params = [{pipeline_mode = #tpu.pipeline_mode<synchronous>, transform_indices = @transform_0, window_bounds = array<i64: 16, 32>}, {pipeline_mode = #tpu.pipeline_mode<synchronous>, transform_indices = @transform_1, window_bounds = array<i64: 16, 32>}, {pipeline_mode = #tpu.pipeline_mode<synchronous>, transform_indices = @transform_2, window_bounds = array<i64: 16, 32>}, {pipeline_mode = #tpu.pipeline_mode<synchronous>, transform_indices = @transform_3, window_bounds = array<i64: 32, 768>}, {pipeline_mode = #tpu.pipeline_mode<synchronous>, transform_indices = @transform_4, window_bounds = array<i64: 64, 32>}, {pipeline_mode = #tpu.pipeline_mode<synchronous>, transform_indices = @transform_5, window_bounds = array<i64: 13, 128>}, {pipeline_mode = #tpu.pipeline_mode<synchronous>, transform_indices = @transform_6, window_bounds = array<i64: 16, 32>}]} {
    %c0 = arith.constant 0 : index
    %c0_0 = arith.constant 0 : index
    %0 = vector.load %arg3[%c0, %c0_0] : memref<16x32xf32, #tpu.memory_space<vmem>>, vector<16x16xf32>
    %c0_1 = arith.constant 0 : index
    %c16 = arith.constant 16 : index
    %1 = vector.load %arg3[%c0_1, %c16] : memref<16x32xf32, #tpu.memory_space<vmem>>, vector<16x16xf32>
    %c0_2 = arith.constant 0 : index
    %c0_3 = arith.constant 0 : index
    %2 = vector.load %arg6[%c0_2, %c0_3] : memref<13x128xf32, #tpu.memory_space<vmem>>, vector<1x96xf32>
    %c1 = arith.constant 1 : index
    %c0_4 = arith.constant 0 : index
    %3 = vector.load %arg6[%c1, %c0_4] : memref<13x128xf32, #tpu.memory_space<vmem>>, vector<1x32xf32>
    %c2 = arith.constant 2 : index
    %c0_5 = arith.constant 0 : index
    %4 = vector.load %arg6[%c2, %c0_5] : memref<13x128xf32, #tpu.memory_space<vmem>>, vector<1x32xf32>
    %c3 = arith.constant 3 : index
    %c0_6 = arith.constant 0 : index
    %5 = vector.load %arg6[%c3, %c0_6] : memref<13x128xf32, #tpu.memory_space<vmem>>, vector<1x64xf32>
    %c4 = arith.constant 4 : index
    %c0_7 = arith.constant 0 : index
    %6 = vector.load %arg6[%c4, %c0_7] : memref<13x128xf32, #tpu.memory_space<vmem>>, vector<1x32xf32>
    %c5 = arith.constant 5 : index
    %c0_8 = arith.constant 0 : index
    %7 = vector.load %arg6[%c5, %c0_8] : memref<13x128xf32, #tpu.memory_space<vmem>>, vector<1x64xf32>
    %c6 = arith.constant 6 : index
    %c0_9 = arith.constant 0 : index
    %8 = vector.load %arg6[%c6, %c0_9] : memref<13x128xf32, #tpu.memory_space<vmem>>, vector<1x32xf32>
    %c7 = arith.constant 7 : index
    %c0_10 = arith.constant 0 : index
    %9 = vector.load %arg6[%c7, %c0_10] : memref<13x128xf32, #tpu.memory_space<vmem>>, vector<1x32xf32>
    %c8 = arith.constant 8 : index
    %c0_11 = arith.constant 0 : index
    %10 = vector.load %arg6[%c8, %c0_11] : memref<13x128xf32, #tpu.memory_space<vmem>>, vector<1x32xf32>
    %c9 = arith.constant 9 : index
    %c0_12 = arith.constant 0 : index
    %11 = vector.load %arg6[%c9, %c0_12] : memref<13x128xf32, #tpu.memory_space<vmem>>, vector<1x32xf32>
    %c10 = arith.constant 10 : index
    %c0_13 = arith.constant 0 : index
    %12 = vector.load %arg6[%c10, %c0_13] : memref<13x128xf32, #tpu.memory_space<vmem>>, vector<1x32xf32>
    %c11 = arith.constant 11 : index
    %c0_14 = arith.constant 0 : index
    %13 = vector.load %arg6[%c11, %c0_14] : memref<13x128xf32, #tpu.memory_space<vmem>>, vector<1x32xf32>
    %c12 = arith.constant 12 : index
    %c0_15 = arith.constant 0 : index
    %14 = vector.load %arg6[%c12, %c0_15] : memref<13x128xf32, #tpu.memory_space<vmem>>, vector<1x32xf32>
    %c0_16 = arith.constant 0 : index
    %c0_17 = arith.constant 0 : index
    %15 = vector.load %arg4[%c0_16, %c0_17] : memref<32x768xf32, #tpu.memory_space<vmem>>, vector<32x96xf32>
    %c0_18 = arith.constant 0 : index
    %c128 = arith.constant 128 : index
    %16 = vector.load %arg4[%c0_18, %c128] : memref<32x768xf32, #tpu.memory_space<vmem>>, vector<32x32xf32>
    %c0_19 = arith.constant 0 : index
    %c256 = arith.constant 256 : index
    %17 = vector.load %arg4[%c0_19, %c256] : memref<32x768xf32, #tpu.memory_space<vmem>>, vector<32x32xf32>
    %c0_20 = arith.constant 0 : index
    %c384 = arith.constant 384 : index
    %18 = vector.load %arg4[%c0_20, %c384] : memref<32x768xf32, #tpu.memory_space<vmem>>, vector<32x64xf32>
    %c0_21 = arith.constant 0 : index
    %c512 = arith.constant 512 : index
    %19 = vector.load %arg4[%c0_21, %c512] : memref<32x768xf32, #tpu.memory_space<vmem>>, vector<32x32xf32>
    %c0_22 = arith.constant 0 : index
    %c640 = arith.constant 640 : index
    %20 = vector.load %arg4[%c0_22, %c640] : memref<32x768xf32, #tpu.memory_space<vmem>>, vector<32x64xf32>
    %c0_23 = arith.constant 0 : index
    %c0_24 = arith.constant 0 : index
    %21 = vector.load %arg5[%c0_23, %c0_24] : memref<64x32xf32, #tpu.memory_space<vmem>>, vector<64x32xf32>
    %c0_25 = arith.constant 0 : index
    %c0_26 = arith.constant 0 : index
    %22 = vector.load %arg1[%c0_25, %c0_26] : memref<16x32xf32, #tpu.memory_space<vmem>>, vector<16x32xf32>
    %c0_27 = arith.constant 0 : index
    %c0_28 = arith.constant 0 : index
    %23 = vector.load %arg2[%c0_27, %c0_28] : memref<16x32xf32, #tpu.memory_space<vmem>>, vector<16x32xf32>
    %cst = arith.constant dense<0.000000e+00> : vector<16xf32>
    %24 = vector.multi_reduction <add>, %22, %cst [1] : vector<16x32xf32> to vector<16xf32>
    %25 = vector.shape_cast %24 : vector<16xf32> to vector<16x1xf32>
    %cst_29 = arith.constant 3.200000e+01 : f32
    %26 = vector.broadcast %cst_29 : f32 to vector<16x1xf32>
    %27 = arith.divf %25, %26 : vector<16x1xf32>
    %28 = vector.broadcast %27 : vector<16x1xf32> to vector<16x32xf32>
    %29 = arith.subf %22, %28 : vector<16x32xf32>
    %30 = arith.mulf %29, %29 : vector<16x32xf32>
    %cst_30 = arith.constant dense<0.000000e+00> : vector<16xf32>
    %31 = vector.multi_reduction <add>, %30, %cst_30 [1] : vector<16x32xf32> to vector<16xf32>
    %32 = vector.shape_cast %31 : vector<16xf32> to vector<16x1xf32>
    %cst_31 = arith.constant 0.0322580636 : f32
    %33 = vector.broadcast %cst_31 : f32 to vector<16x1xf32>
    %34 = arith.mulf %32, %33 : vector<16x1xf32>
    %35 = vector.broadcast %27 : vector<16x1xf32> to vector<16x32xf32>
    %36 = arith.subf %22, %35 : vector<16x32xf32>
    %37 = vector.broadcast %9 : vector<1x32xf32> to vector<16x32xf32>
    %38 = arith.mulf %37, %36 : vector<16x32xf32>
    %39 = math.sqrt %34 : vector<16x1xf32>
    %cst_32 = arith.constant 9.99999997E-7 : f32
    %40 = vector.broadcast %cst_32 : f32 to vector<16x1xf32>
    %41 = arith.addf %39, %40 : vector<16x1xf32>
    %42 = vector.broadcast %41 : vector<16x1xf32> to vector<16x32xf32>
    %43 = arith.divf %38, %42 : vector<16x32xf32>
    %44 = vector.broadcast %12 : vector<1x32xf32> to vector<16x32xf32>
    %45 = arith.addf %43, %44 : vector<16x32xf32>
    %cst_33 = arith.constant dense<0.000000e+00> : vector<16x96xf32>
    %46 = tpu.matmul %45, %15, %cst_33 {dimension_numbers = #tpu.dot_dimension_numbers<[1], [0], [0], [1], [0, 0, 1, 1], [], []>} : vector<16x32xf32>, vector<32x96xf32>, vector<16x96xf32> -> vector<16x96xf32>
    %47 = vector.broadcast %2 : vector<1x96xf32> to vector<16x96xf32>
    %48 = arith.addf %46, %47 : vector<16x96xf32>
    %49 = vector.extract_strided_slice %48 {offsets = [0, 0], sizes = [16, 32], strides = [1, 1]} : vector<16x96xf32> to vector<16x32xf32>
    %50 = vector.extract_strided_slice %48 {offsets = [0, 32], sizes = [16, 32], strides = [1, 1]} : vector<16x96xf32> to vector<16x32xf32>
    %51 = vector.extract_strided_slice %48 {offsets = [0, 64], sizes = [16, 32], strides = [1, 1]} : vector<16x96xf32> to vector<16x32xf32>
    %52 = vector.extract_strided_slice %49 {offsets = [0, 0], sizes = [16, 8], strides = [1, 1]} : vector<16x32xf32> to vector<16x8xf32>
    %53 = vector.extract_strided_slice %50 {offsets = [0, 0], sizes = [16, 8], strides = [1, 1]} : vector<16x32xf32> to vector<16x8xf32>
    %cst_34 = arith.constant dense<0.000000e+00> : vector<16x16xf32>
    %54 = tpu.matmul %52, %53, %cst_34 {dimension_numbers = #tpu.dot_dimension_numbers<[1], [1], [0], [0], [0, 0, 1, 0], [], []>} : vector<16x8xf32>, vector<16x8xf32>, vector<16x16xf32> -> vector<16x16xf32>
    %55 = arith.addf %54, %0 : vector<16x16xf32>
    %cst_35 = arith.constant dense<0xFF800000> : vector<16xf32>
    %56 = vector.multi_reduction <maximumf>, %55, %cst_35 [1] : vector<16x16xf32> to vector<16xf32>
    %57 = vector.shape_cast %56 : vector<16xf32> to vector<16x1xf32>
    %58 = vector.broadcast %57 : vector<16x1xf32> to vector<16x16xf32>
    %59 = arith.subf %55, %58 : vector<16x16xf32>
    %60 = math.exp %59 : vector<16x16xf32>
    %cst_36 = arith.constant dense<0.000000e+00> : vector<16xf32>
    %61 = vector.multi_reduction <add>, %60, %cst_36 [1] : vector<16x16xf32> to vector<16xf32>
    %62 = vector.shape_cast %61 : vector<16xf32> to vector<16x1xf32>
    %63 = vector.broadcast %62 : vector<16x1xf32> to vector<16x16xf32>
    %64 = arith.divf %60, %63 : vector<16x16xf32>
    %65 = vector.extract_strided_slice %51 {offsets = [0, 0], sizes = [16, 8], strides = [1, 1]} : vector<16x32xf32> to vector<16x8xf32>
    %cst_37 = arith.constant dense<0.000000e+00> : vector<16x8xf32>
    %66 = tpu.matmul %64, %65, %cst_37 {dimension_numbers = #tpu.dot_dimension_numbers<[1], [0], [0], [1], [0, 0, 1, 1], [], []>} : vector<16x16xf32>, vector<16x8xf32>, vector<16x8xf32> -> vector<16x8xf32>
    %67 = vector.extract_strided_slice %49 {offsets = [0, 8], sizes = [16, 8], strides = [1, 1]} : vector<16x32xf32> to vector<16x8xf32>
    %68 = vector.extract_strided_slice %50 {offsets = [0, 8], sizes = [16, 8], strides = [1, 1]} : vector<16x32xf32> to vector<16x8xf32>
    %cst_38 = arith.constant dense<0.000000e+00> : vector<16x16xf32>
    %69 = tpu.matmul %67, %68, %cst_38 {dimension_numbers = #tpu.dot_dimension_numbers<[1], [1], [0], [0], [0, 0, 1, 0], [], []>} : vector<16x8xf32>, vector<16x8xf32>, vector<16x16xf32> -> vector<16x16xf32>
    %70 = arith.addf %69, %0 : vector<16x16xf32>
    %cst_39 = arith.constant dense<0xFF800000> : vector<16xf32>
    %71 = vector.multi_reduction <maximumf>, %70, %cst_39 [1] : vector<16x16xf32> to vector<16xf32>
    %72 = vector.shape_cast %71 : vector<16xf32> to vector<16x1xf32>
    %73 = vector.broadcast %72 : vector<16x1xf32> to vector<16x16xf32>
    %74 = arith.subf %70, %73 : vector<16x16xf32>
    %75 = math.exp %74 : vector<16x16xf32>
    %cst_40 = arith.constant dense<0.000000e+00> : vector<16xf32>
    %76 = vector.multi_reduction <add>, %75, %cst_40 [1] : vector<16x16xf32> to vector<16xf32>
    %77 = vector.shape_cast %76 : vector<16xf32> to vector<16x1xf32>
    %78 = vector.broadcast %77 : vector<16x1xf32> to vector<16x16xf32>
    %79 = arith.divf %75, %78 : vector<16x16xf32>
    %80 = vector.extract_strided_slice %51 {offsets = [0, 8], sizes = [16, 8], strides = [1, 1]} : vector<16x32xf32> to vector<16x8xf32>
    %cst_41 = arith.constant dense<0.000000e+00> : vector<16x8xf32>
    %81 = tpu.matmul %79, %80, %cst_41 {dimension_numbers = #tpu.dot_dimension_numbers<[1], [0], [0], [1], [0, 0, 1, 1], [], []>} : vector<16x16xf32>, vector<16x8xf32>, vector<16x8xf32> -> vector<16x8xf32>
    %82 = vector.extract_strided_slice %49 {offsets = [0, 16], sizes = [16, 8], strides = [1, 1]} : vector<16x32xf32> to vector<16x8xf32>
    %83 = vector.extract_strided_slice %50 {offsets = [0, 16], sizes = [16, 8], strides = [1, 1]} : vector<16x32xf32> to vector<16x8xf32>
    %cst_42 = arith.constant dense<0.000000e+00> : vector<16x16xf32>
    %84 = tpu.matmul %82, %83, %cst_42 {dimension_numbers = #tpu.dot_dimension_numbers<[1], [1], [0], [0], [0, 0, 1, 0], [], []>} : vector<16x8xf32>, vector<16x8xf32>, vector<16x16xf32> -> vector<16x16xf32>
    %85 = arith.addf %84, %0 : vector<16x16xf32>
    %cst_43 = arith.constant dense<0xFF800000> : vector<16xf32>
    %86 = vector.multi_reduction <maximumf>, %85, %cst_43 [1] : vector<16x16xf32> to vector<16xf32>
    %87 = vector.shape_cast %86 : vector<16xf32> to vector<16x1xf32>
    %88 = vector.broadcast %87 : vector<16x1xf32> to vector<16x16xf32>
    %89 = arith.subf %85, %88 : vector<16x16xf32>
    %90 = math.exp %89 : vector<16x16xf32>
    %cst_44 = arith.constant dense<0.000000e+00> : vector<16xf32>
    %91 = vector.multi_reduction <add>, %90, %cst_44 [1] : vector<16x16xf32> to vector<16xf32>
    %92 = vector.shape_cast %91 : vector<16xf32> to vector<16x1xf32>
    %93 = vector.broadcast %92 : vector<16x1xf32> to vector<16x16xf32>
    %94 = arith.divf %90, %93 : vector<16x16xf32>
    %95 = vector.extract_strided_slice %51 {offsets = [0, 16], sizes = [16, 8], strides = [1, 1]} : vector<16x32xf32> to vector<16x8xf32>
    %cst_45 = arith.constant dense<0.000000e+00> : vector<16x8xf32>
    %96 = tpu.matmul %94, %95, %cst_45 {dimension_numbers = #tpu.dot_dimension_numbers<[1], [0], [0], [1], [0, 0, 1, 1], [], []>} : vector<16x16xf32>, vector<16x8xf32>, vector<16x8xf32> -> vector<16x8xf32>
    %97 = vector.extract_strided_slice %49 {offsets = [0, 24], sizes = [16, 8], strides = [1, 1]} : vector<16x32xf32> to vector<16x8xf32>
    %98 = vector.extract_strided_slice %50 {offsets = [0, 24], sizes = [16, 8], strides = [1, 1]} : vector<16x32xf32> to vector<16x8xf32>
    %cst_46 = arith.constant dense<0.000000e+00> : vector<16x16xf32>
    %99 = tpu.matmul %97, %98, %cst_46 {dimension_numbers = #tpu.dot_dimension_numbers<[1], [1], [0], [0], [0, 0, 1, 0], [], []>} : vector<16x8xf32>, vector<16x8xf32>, vector<16x16xf32> -> vector<16x16xf32>
    %100 = arith.addf %99, %0 : vector<16x16xf32>
    %cst_47 = arith.constant dense<0xFF800000> : vector<16xf32>
    %101 = vector.multi_reduction <maximumf>, %100, %cst_47 [1] : vector<16x16xf32> to vector<16xf32>
    %102 = vector.shape_cast %101 : vector<16xf32> to vector<16x1xf32>
    %103 = vector.broadcast %102 : vector<16x1xf32> to vector<16x16xf32>
    %104 = arith.subf %100, %103 : vector<16x16xf32>
    %105 = math.exp %104 : vector<16x16xf32>
    %cst_48 = arith.constant dense<0.000000e+00> : vector<16xf32>
    %106 = vector.multi_reduction <add>, %105, %cst_48 [1] : vector<16x16xf32> to vector<16xf32>
    %107 = vector.shape_cast %106 : vector<16xf32> to vector<16x1xf32>
    %108 = vector.broadcast %107 : vector<16x1xf32> to vector<16x16xf32>
    %109 = arith.divf %105, %108 : vector<16x16xf32>
    %110 = vector.extract_strided_slice %51 {offsets = [0, 24], sizes = [16, 8], strides = [1, 1]} : vector<16x32xf32> to vector<16x8xf32>
    %cst_49 = arith.constant dense<0.000000e+00> : vector<16x8xf32>
    %111 = tpu.matmul %109, %110, %cst_49 {dimension_numbers = #tpu.dot_dimension_numbers<[1], [0], [0], [1], [0, 0, 1, 1], [], []>} : vector<16x16xf32>, vector<16x8xf32>, vector<16x8xf32> -> vector<16x8xf32>
    %112 = tpu.concatenate %66, %81, %96, %111 in 1 : vector<16x8xf32>, vector<16x8xf32>, vector<16x8xf32>, vector<16x8xf32> -> vector<16x32xf32>
    %cst_50 = arith.constant dense<0.000000e+00> : vector<16x32xf32>
    %113 = tpu.matmul %112, %16, %cst_50 {dimension_numbers = #tpu.dot_dimension_numbers<[1], [0], [0], [1], [0, 0, 1, 1], [], []>} : vector<16x32xf32>, vector<32x32xf32>, vector<16x32xf32> -> vector<16x32xf32>
    %114 = vector.broadcast %3 : vector<1x32xf32> to vector<16x32xf32>
    %115 = arith.addf %113, %114 : vector<16x32xf32>
    %116 = arith.addf %22, %115 : vector<16x32xf32>
    %cst_51 = arith.constant dense<0.000000e+00> : vector<16xf32>
    %117 = vector.multi_reduction <add>, %116, %cst_51 [1] : vector<16x32xf32> to vector<16xf32>
    %118 = vector.shape_cast %117 : vector<16xf32> to vector<16x1xf32>
    %cst_52 = arith.constant 3.200000e+01 : f32
    %119 = vector.broadcast %cst_52 : f32 to vector<16x1xf32>
    %120 = arith.divf %118, %119 : vector<16x1xf32>
    %121 = vector.broadcast %120 : vector<16x1xf32> to vector<16x32xf32>
    %122 = arith.subf %116, %121 : vector<16x32xf32>
    %123 = arith.mulf %122, %122 : vector<16x32xf32>
    %cst_53 = arith.constant dense<0.000000e+00> : vector<16xf32>
    %124 = vector.multi_reduction <add>, %123, %cst_53 [1] : vector<16x32xf32> to vector<16xf32>
    %125 = vector.shape_cast %124 : vector<16xf32> to vector<16x1xf32>
    %cst_54 = arith.constant 0.0322580636 : f32
    %126 = vector.broadcast %cst_54 : f32 to vector<16x1xf32>
    %127 = arith.mulf %125, %126 : vector<16x1xf32>
    %128 = vector.broadcast %120 : vector<16x1xf32> to vector<16x32xf32>
    %129 = arith.subf %116, %128 : vector<16x32xf32>
    %130 = vector.broadcast %10 : vector<1x32xf32> to vector<16x32xf32>
    %131 = arith.mulf %130, %129 : vector<16x32xf32>
    %132 = math.sqrt %127 : vector<16x1xf32>
    %cst_55 = arith.constant 9.99999997E-7 : f32
    %133 = vector.broadcast %cst_55 : f32 to vector<16x1xf32>
    %134 = arith.addf %132, %133 : vector<16x1xf32>
    %135 = vector.broadcast %134 : vector<16x1xf32> to vector<16x32xf32>
    %136 = arith.divf %131, %135 : vector<16x32xf32>
    %137 = vector.broadcast %13 : vector<1x32xf32> to vector<16x32xf32>
    %138 = arith.addf %136, %137 : vector<16x32xf32>
    %cst_56 = arith.constant dense<0.000000e+00> : vector<16x32xf32>
    %139 = tpu.matmul %138, %17, %cst_56 {dimension_numbers = #tpu.dot_dimension_numbers<[1], [0], [0], [1], [0, 0, 1, 1], [], []>} : vector<16x32xf32>, vector<32x32xf32>, vector<16x32xf32> -> vector<16x32xf32>
    %140 = vector.broadcast %4 : vector<1x32xf32> to vector<16x32xf32>
    %141 = arith.addf %139, %140 : vector<16x32xf32>
    %cst_57 = arith.constant dense<0.000000e+00> : vector<16x64xf32>
    %142 = tpu.matmul %23, %18, %cst_57 {dimension_numbers = #tpu.dot_dimension_numbers<[1], [0], [0], [1], [0, 0, 1, 1], [], []>} : vector<16x32xf32>, vector<32x64xf32>, vector<16x64xf32> -> vector<16x64xf32>
    %143 = vector.broadcast %5 : vector<1x64xf32> to vector<16x64xf32>
    %144 = arith.addf %142, %143 : vector<16x64xf32>
    %145 = vector.extract_strided_slice %144 {offsets = [0, 0], sizes = [16, 32], strides = [1, 1]} : vector<16x64xf32> to vector<16x32xf32>
    %146 = vector.extract_strided_slice %144 {offsets = [0, 32], sizes = [16, 32], strides = [1, 1]} : vector<16x64xf32> to vector<16x32xf32>
    %147 = vector.extract_strided_slice %141 {offsets = [0, 0], sizes = [16, 8], strides = [1, 1]} : vector<16x32xf32> to vector<16x8xf32>
    %148 = vector.extract_strided_slice %145 {offsets = [0, 0], sizes = [16, 8], strides = [1, 1]} : vector<16x32xf32> to vector<16x8xf32>
    %cst_58 = arith.constant dense<0.000000e+00> : vector<16x16xf32>
    %149 = tpu.matmul %147, %148, %cst_58 {dimension_numbers = #tpu.dot_dimension_numbers<[1], [1], [0], [0], [0, 0, 1, 0], [], []>} : vector<16x8xf32>, vector<16x8xf32>, vector<16x16xf32> -> vector<16x16xf32>
    %150 = arith.addf %149, %1 : vector<16x16xf32>
    %cst_59 = arith.constant dense<0xFF800000> : vector<16xf32>
    %151 = vector.multi_reduction <maximumf>, %150, %cst_59 [1] : vector<16x16xf32> to vector<16xf32>
    %152 = vector.shape_cast %151 : vector<16xf32> to vector<16x1xf32>
    %153 = vector.broadcast %152 : vector<16x1xf32> to vector<16x16xf32>
    %154 = arith.subf %150, %153 : vector<16x16xf32>
    %155 = math.exp %154 : vector<16x16xf32>
    %cst_60 = arith.constant dense<0.000000e+00> : vector<16xf32>
    %156 = vector.multi_reduction <add>, %155, %cst_60 [1] : vector<16x16xf32> to vector<16xf32>
    %157 = vector.shape_cast %156 : vector<16xf32> to vector<16x1xf32>
    %158 = vector.broadcast %157 : vector<16x1xf32> to vector<16x16xf32>
    %159 = arith.divf %155, %158 : vector<16x16xf32>
    %160 = vector.extract_strided_slice %146 {offsets = [0, 0], sizes = [16, 8], strides = [1, 1]} : vector<16x32xf32> to vector<16x8xf32>
    %cst_61 = arith.constant dense<0.000000e+00> : vector<16x8xf32>
    %161 = tpu.matmul %159, %160, %cst_61 {dimension_numbers = #tpu.dot_dimension_numbers<[1], [0], [0], [1], [0, 0, 1, 1], [], []>} : vector<16x16xf32>, vector<16x8xf32>, vector<16x8xf32> -> vector<16x8xf32>
    %162 = vector.extract_strided_slice %141 {offsets = [0, 8], sizes = [16, 8], strides = [1, 1]} : vector<16x32xf32> to vector<16x8xf32>
    %163 = vector.extract_strided_slice %145 {offsets = [0, 8], sizes = [16, 8], strides = [1, 1]} : vector<16x32xf32> to vector<16x8xf32>
    %cst_62 = arith.constant dense<0.000000e+00> : vector<16x16xf32>
    %164 = tpu.matmul %162, %163, %cst_62 {dimension_numbers = #tpu.dot_dimension_numbers<[1], [1], [0], [0], [0, 0, 1, 0], [], []>} : vector<16x8xf32>, vector<16x8xf32>, vector<16x16xf32> -> vector<16x16xf32>
    %165 = arith.addf %164, %1 : vector<16x16xf32>
    %cst_63 = arith.constant dense<0xFF800000> : vector<16xf32>
    %166 = vector.multi_reduction <maximumf>, %165, %cst_63 [1] : vector<16x16xf32> to vector<16xf32>
    %167 = vector.shape_cast %166 : vector<16xf32> to vector<16x1xf32>
    %168 = vector.broadcast %167 : vector<16x1xf32> to vector<16x16xf32>
    %169 = arith.subf %165, %168 : vector<16x16xf32>
    %170 = math.exp %169 : vector<16x16xf32>
    %cst_64 = arith.constant dense<0.000000e+00> : vector<16xf32>
    %171 = vector.multi_reduction <add>, %170, %cst_64 [1] : vector<16x16xf32> to vector<16xf32>
    %172 = vector.shape_cast %171 : vector<16xf32> to vector<16x1xf32>
    %173 = vector.broadcast %172 : vector<16x1xf32> to vector<16x16xf32>
    %174 = arith.divf %170, %173 : vector<16x16xf32>
    %175 = vector.extract_strided_slice %146 {offsets = [0, 8], sizes = [16, 8], strides = [1, 1]} : vector<16x32xf32> to vector<16x8xf32>
    %cst_65 = arith.constant dense<0.000000e+00> : vector<16x8xf32>
    %176 = tpu.matmul %174, %175, %cst_65 {dimension_numbers = #tpu.dot_dimension_numbers<[1], [0], [0], [1], [0, 0, 1, 1], [], []>} : vector<16x16xf32>, vector<16x8xf32>, vector<16x8xf32> -> vector<16x8xf32>
    %177 = vector.extract_strided_slice %141 {offsets = [0, 16], sizes = [16, 8], strides = [1, 1]} : vector<16x32xf32> to vector<16x8xf32>
    %178 = vector.extract_strided_slice %145 {offsets = [0, 16], sizes = [16, 8], strides = [1, 1]} : vector<16x32xf32> to vector<16x8xf32>
    %cst_66 = arith.constant dense<0.000000e+00> : vector<16x16xf32>
    %179 = tpu.matmul %177, %178, %cst_66 {dimension_numbers = #tpu.dot_dimension_numbers<[1], [1], [0], [0], [0, 0, 1, 0], [], []>} : vector<16x8xf32>, vector<16x8xf32>, vector<16x16xf32> -> vector<16x16xf32>
    %180 = arith.addf %179, %1 : vector<16x16xf32>
    %cst_67 = arith.constant dense<0xFF800000> : vector<16xf32>
    %181 = vector.multi_reduction <maximumf>, %180, %cst_67 [1] : vector<16x16xf32> to vector<16xf32>
    %182 = vector.shape_cast %181 : vector<16xf32> to vector<16x1xf32>
    %183 = vector.broadcast %182 : vector<16x1xf32> to vector<16x16xf32>
    %184 = arith.subf %180, %183 : vector<16x16xf32>
    %185 = math.exp %184 : vector<16x16xf32>
    %cst_68 = arith.constant dense<0.000000e+00> : vector<16xf32>
    %186 = vector.multi_reduction <add>, %185, %cst_68 [1] : vector<16x16xf32> to vector<16xf32>
    %187 = vector.shape_cast %186 : vector<16xf32> to vector<16x1xf32>
    %188 = vector.broadcast %187 : vector<16x1xf32> to vector<16x16xf32>
    %189 = arith.divf %185, %188 : vector<16x16xf32>
    %190 = vector.extract_strided_slice %146 {offsets = [0, 16], sizes = [16, 8], strides = [1, 1]} : vector<16x32xf32> to vector<16x8xf32>
    %cst_69 = arith.constant dense<0.000000e+00> : vector<16x8xf32>
    %191 = tpu.matmul %189, %190, %cst_69 {dimension_numbers = #tpu.dot_dimension_numbers<[1], [0], [0], [1], [0, 0, 1, 1], [], []>} : vector<16x16xf32>, vector<16x8xf32>, vector<16x8xf32> -> vector<16x8xf32>
    %192 = vector.extract_strided_slice %141 {offsets = [0, 24], sizes = [16, 8], strides = [1, 1]} : vector<16x32xf32> to vector<16x8xf32>
    %193 = vector.extract_strided_slice %145 {offsets = [0, 24], sizes = [16, 8], strides = [1, 1]} : vector<16x32xf32> to vector<16x8xf32>
    %cst_70 = arith.constant dense<0.000000e+00> : vector<16x16xf32>
    %194 = tpu.matmul %192, %193, %cst_70 {dimension_numbers = #tpu.dot_dimension_numbers<[1], [1], [0], [0], [0, 0, 1, 0], [], []>} : vector<16x8xf32>, vector<16x8xf32>, vector<16x16xf32> -> vector<16x16xf32>
    %195 = arith.addf %194, %1 : vector<16x16xf32>
    %cst_71 = arith.constant dense<0xFF800000> : vector<16xf32>
    %196 = vector.multi_reduction <maximumf>, %195, %cst_71 [1] : vector<16x16xf32> to vector<16xf32>
    %197 = vector.shape_cast %196 : vector<16xf32> to vector<16x1xf32>
    %198 = vector.broadcast %197 : vector<16x1xf32> to vector<16x16xf32>
    %199 = arith.subf %195, %198 : vector<16x16xf32>
    %200 = math.exp %199 : vector<16x16xf32>
    %cst_72 = arith.constant dense<0.000000e+00> : vector<16xf32>
    %201 = vector.multi_reduction <add>, %200, %cst_72 [1] : vector<16x16xf32> to vector<16xf32>
    %202 = vector.shape_cast %201 : vector<16xf32> to vector<16x1xf32>
    %203 = vector.broadcast %202 : vector<16x1xf32> to vector<16x16xf32>
    %204 = arith.divf %200, %203 : vector<16x16xf32>
    %205 = vector.extract_strided_slice %146 {offsets = [0, 24], sizes = [16, 8], strides = [1, 1]} : vector<16x32xf32> to vector<16x8xf32>
    %cst_73 = arith.constant dense<0.000000e+00> : vector<16x8xf32>
    %206 = tpu.matmul %204, %205, %cst_73 {dimension_numbers = #tpu.dot_dimension_numbers<[1], [0], [0], [1], [0, 0, 1, 1], [], []>} : vector<16x16xf32>, vector<16x8xf32>, vector<16x8xf32> -> vector<16x8xf32>
    %207 = tpu.concatenate %161, %176, %191, %206 in 1 : vector<16x8xf32>, vector<16x8xf32>, vector<16x8xf32>, vector<16x8xf32> -> vector<16x32xf32>
    %cst_74 = arith.constant dense<0.000000e+00> : vector<16x32xf32>
    %208 = tpu.matmul %207, %19, %cst_74 {dimension_numbers = #tpu.dot_dimension_numbers<[1], [0], [0], [1], [0, 0, 1, 1], [], []>} : vector<16x32xf32>, vector<32x32xf32>, vector<16x32xf32> -> vector<16x32xf32>
    %209 = vector.broadcast %6 : vector<1x32xf32> to vector<16x32xf32>
    %210 = arith.addf %208, %209 : vector<16x32xf32>
    %211 = arith.addf %116, %210 : vector<16x32xf32>
    %cst_75 = arith.constant dense<0.000000e+00> : vector<16xf32>
    %212 = vector.multi_reduction <add>, %211, %cst_75 [1] : vector<16x32xf32> to vector<16xf32>
    %213 = vector.shape_cast %212 : vector<16xf32> to vector<16x1xf32>
    %cst_76 = arith.constant 3.200000e+01 : f32
    %214 = vector.broadcast %cst_76 : f32 to vector<16x1xf32>
    %215 = arith.divf %213, %214 : vector<16x1xf32>
    %216 = vector.broadcast %215 : vector<16x1xf32> to vector<16x32xf32>
    %217 = arith.subf %211, %216 : vector<16x32xf32>
    %218 = arith.mulf %217, %217 : vector<16x32xf32>
    %cst_77 = arith.constant dense<0.000000e+00> : vector<16xf32>
    %219 = vector.multi_reduction <add>, %218, %cst_77 [1] : vector<16x32xf32> to vector<16xf32>
    %220 = vector.shape_cast %219 : vector<16xf32> to vector<16x1xf32>
    %cst_78 = arith.constant 0.0322580636 : f32
    %221 = vector.broadcast %cst_78 : f32 to vector<16x1xf32>
    %222 = arith.mulf %220, %221 : vector<16x1xf32>
    %223 = vector.broadcast %215 : vector<16x1xf32> to vector<16x32xf32>
    %224 = arith.subf %211, %223 : vector<16x32xf32>
    %225 = vector.broadcast %11 : vector<1x32xf32> to vector<16x32xf32>
    %226 = arith.mulf %225, %224 : vector<16x32xf32>
    %227 = math.sqrt %222 : vector<16x1xf32>
    %cst_79 = arith.constant 9.99999997E-7 : f32
    %228 = vector.broadcast %cst_79 : f32 to vector<16x1xf32>
    %229 = arith.addf %227, %228 : vector<16x1xf32>
    %230 = vector.broadcast %229 : vector<16x1xf32> to vector<16x32xf32>
    %231 = arith.divf %226, %230 : vector<16x32xf32>
    %232 = vector.broadcast %14 : vector<1x32xf32> to vector<16x32xf32>
    %233 = arith.addf %231, %232 : vector<16x32xf32>
    %cst_80 = arith.constant dense<0.000000e+00> : vector<16x64xf32>
    %234 = tpu.matmul %233, %20, %cst_80 {dimension_numbers = #tpu.dot_dimension_numbers<[1], [0], [0], [1], [0, 0, 1, 1], [], []>} : vector<16x32xf32>, vector<32x64xf32>, vector<16x64xf32> -> vector<16x64xf32>
    %235 = vector.broadcast %7 : vector<1x64xf32> to vector<16x64xf32>
    %236 = arith.addf %234, %235 : vector<16x64xf32>
    %cst_81 = arith.constant 0.000000e+00 : f32
    %237 = vector.broadcast %cst_81 : f32 to vector<16x64xf32>
    %238 = arith.maximumf %236, %237 : vector<16x64xf32>
    %cst_82 = arith.constant dense<0.000000e+00> : vector<16x32xf32>
    %239 = tpu.matmul %238, %21, %cst_82 {dimension_numbers = #tpu.dot_dimension_numbers<[1], [0], [0], [1], [0, 0, 1, 1], [], []>} : vector<16x64xf32>, vector<64x32xf32>, vector<16x32xf32> -> vector<16x32xf32>
    %240 = arith.addf %211, %239 : vector<16x32xf32>
    %241 = vector.broadcast %8 : vector<1x32xf32> to vector<16x32xf32>
    %242 = arith.addf %240, %241 : vector<16x32xf32>
    %c0_83 = arith.constant 0 : index
    %c0_84 = arith.constant 0 : index
    %243 = vector.load %arg7[%c0_83, %c0_84] : memref<16x32xf32, #tpu.memory_space<vmem>>, vector<16x32xf32>
    tpu.vector_store %arg7[%c0_83, %c0_84], %242 {strides = array<i32>} : memref<16x32xf32, #tpu.memory_space<vmem>>, vector<16x32xf32>,
    return
  }
  func.func @transform_0(%arg0: i32) -> (i32, i32) {
    %c0_i32 = arith.constant 0 : i32
    %c0_i32_0 = arith.constant 0 : i32
    %c0_i32_1 = arith.constant 0 : i32
    return %c0_i32, %c0_i32_0 : i32, i32
  }
  func.func @transform_1(%arg0: i32) -> (i32, i32) {
    %c0_i32 = arith.constant 0 : i32
    %c0_i32_0 = arith.constant 0 : i32
    %c0_i32_1 = arith.constant 0 : i32
    return %c0_i32, %c0_i32_0 : i32, i32
  }
  func.func @transform_2(%arg0: i32) -> (i32, i32) {
    %c0_i32 = arith.constant 0 : i32
    %c0_i32_0 = arith.constant 0 : i32
    %c0_i32_1 = arith.constant 0 : i32
    return %c0_i32, %c0_i32_0 : i32, i32
  }
  func.func @transform_3(%arg0: i32) -> (i32, i32) {
    %c0_i32 = arith.constant 0 : i32
    %c0_i32_0 = arith.constant 0 : i32
    %c0_i32_1 = arith.constant 0 : i32
    return %c0_i32, %c0_i32_0 : i32, i32
  }
  func.func @transform_4(%arg0: i32) -> (i32, i32) {
    %c0_i32 = arith.constant 0 : i32
    %c0_i32_0 = arith.constant 0 : i32
    %c0_i32_1 = arith.constant 0 : i32
    return %c0_i32, %c0_i32_0 : i32, i32
  }
  func.func @transform_5(%arg0: i32) -> (i32, i32) {
    %c0_i32 = arith.constant 0 : i32
    %c0_i32_0 = arith.constant 0 : i32
    %c0_i32_1 = arith.constant 0 : i32
    return %c0_i32, %c0_i32_0 : i32, i32
  }
  func.func @transform_6(%arg0: i32) -> (i32, i32) {
    %c0_i32 = arith.constant 0 : i32
    %c0_i32_0 = arith.constant 0 : i32
    %c0_i32_1 = arith.constant 0 : i32
    return %c0_i32, %c0_i32_0 : i32, i32
  }
}

</mosaic_0001>

<bundles_post_ra>
// kernel: decoder_layer.1
= control target key start
LH: loop header
LB: loop body
LE: loop exit
PB: predicated region body
PF: predicated region fallthrough
CT: control target
= control target key end

     0   :  { %vm75_vm0 = vcmask 261120   ;;  %s2497_s0 = inlined_call_operand.vmem [shape: f32[16,32], index: 0, kind: input, shape index: {}]   ;;  %s2498_s1 = inlined_call_operand.vmem [shape: f32[16,32], index: 1, kind: input, shape index: {}]   ;;  %s2499_s2 = inlined_call_operand.vmem [shape: f32[16,32], index: 2, kind: input, shape index: {}]   ;;  %s2500_s3 = inlined_call_operand.vmem [shape: f32[32,768], index: 3, kind: input, shape index: {}]   ;;  %s2501_s4 = inlined_call_operand.vmem [shape: f32[64,32], index: 4, kind: input, shape index: {}]   ;;  %s2502_s5 = inlined_call_operand.vmem [shape: f32[13,128], index: 5, kind: input, shape index: {}]   ;;  %s2503_s6 = inlined_call_operand.hbm [shape: f32[16,32], index: 6, kind: output, shape index: {}]  }
   0x1   :  { %v1918_v0 = vld [vmem:[%s2497_s0 + $0x8] sm:$0xff]  ;;  %v1925_v2 = vld [vmem:[%s2497_s0] sm:$0xff] }
   0x2   :  { %v79_v1 = vsel %vm75_vm0, %v1918_v0, 0.0 }
   0x3   :  { %80 = vadd.xlane.f32.xlu0 %v79_v1 }
   0x4   :  { %11 = vsyncpa [#allocation3], 0  ;;  %v76_v3 = vsel %vm75_vm0, %v1925_v2, 0.0  ;;  %v1863_v4 = vmov 32.0   ;;  %v42_v21 = vld [vmem:[%s2500_s3 + $0x90] sm:$0xff]  ;;  %v41_v22 = vld [vmem:[%s2500_s3 + $0x60] sm:$0xff] }
   0x5   :  { %1747 = vrcp.f32 %v1863_v4  ;;  %1673 = vmatpush.msra.mxu3 %v42_v21  ;;  %184 = vmatpush.msra.mxu0 %v42_v21  ;;  %v40_v23 = vld [vmem:[%s2500_s3 + $0x30] sm:$0xff]  ;;  %v39_v25 = vld [vmem:[%s2500_s3] sm:$0xff]  ;;  %v1735_v63 = vld [vmem:[%s2502_s5 + $0xa] ss:$0 sm:$0xff]  ;;  %s1864_s14 = smov 88   ;;  %s1865_s15 = smov 96  }
   0x6   :  { %v1734_v55 = vld [vmem:[%s2502_s5 + $0x7] ss:$0 sm:$0xff]  ;;  %s1866_s16 = smov 72   ;;  %s1867_s17 = smov 80   ;;  %vm201_vm14 = vcmask 64512   ;;  %vm233_vm15 = vcmask 130048  }
   0x7   :  { %1674 = vmatpush.msra.mxu3 %v41_v22  ;;  %185 = vmatpush.msra.mxu0 %v41_v22  ;;  %s1868_s18 = smov 120   ;;  %s1869_s19 = smov 112  }
   0x8   :  { %s1870_s20 = smov 104   ;;  %s1872_s0 = smov 64  }
   0x9   :  { %1675 = vmatpush.msra.mxu3 %v40_v23  ;;  %186 = vmatpush.msra.mxu0 %v40_v23  ;;  %s1873_s25 = smov 48   ;;  %s1874_s26 = smov 40  }
   0xa   :  { %s1875_s27 = smov 16   ;;  %s1876_s28 = smov 8  }
   0xb   :  { %77 = vadd.xlane.f32.xlu0 %v76_v3  ;;  %v1748_v5 = vpop.eup %1747  ;;  %1676 = vmatpush.msra.mxu3 %v39_v25  ;;  %s1877_s29 = smov 24  }
   0xc   :  { %v83_v6 = vmul.f32 32.0, %v1748_v5  ;;  %vm87_vm1 = vweird.f32 %v1748_v5  ;;  %187 = vmatpush.msra.mxu0 %v39_v25 }
   0xe   :  { %v84_v7 = vsub.f32 1.0, %v83_v6 }
  0x10   :  { %v85_v8 = vmul.f32 %v1748_v5, %v84_v7 }
  0x12   :  { %v86_v9 = vadd.f32 %v1748_v5, %v85_v8 }
  0x14   :  { %v1929_v10 = vsel %vm87_vm1, %v1748_v5, %v86_v9 }
  0x76   :  { %v81_v11 = vpop.xlane.xlu0 %80 }
  0x77   :  { %v90_v12 = vmul.f32 %v1929_v10, %v81_v11 }
  0x79   :  { %v1933_v13 = vsub.f32 %v1918_v0, %v90_v12 }
  0x7b   :  { %v94_v14 = vmul.f32 %v1933_v13, %v1933_v13  ;;  %v105_v61 = vmul.f32 %v1734_v55, %v1933_v13 }
  0x7d   :  { %v98_v15 = vsel %vm75_vm0, %v94_v14, 0.0 }
  0x7e   :  { %99 = vadd.xlane.f32.xlu1 %v98_v15  ;;  %v78_v16 = vpop.xlane.xlu0 %77 }
  0x7f   :  { %v89_v17 = vmul.f32 %v1929_v10, %v78_v16 }
  0x81   :  { %v1940_v18 = vsub.f32 %v1925_v2, %v89_v17 }
  0x83   :  { %v93_v19 = vmul.f32 %v1940_v18, %v1940_v18  ;;  %v104_v13 = vmul.f32 %v1734_v55, %v1940_v18 }
  0x85   :  { %v95_v20 = vsel %vm75_vm0, %v93_v19, 0.0  ;;  %v1736_v19 = vld [vmem:[%s2502_s5] ss:$0 sm:$0xff] }
  0x86   :  { %96 = vadd.xlane.f32.xlu1 %v95_v20 }
  0xf1   :  { %v100_v24 = vpop.xlane.xlu1 %99 }
  0xf2   :  { %v102_v26 = vmul.f32 0.032258064, %v100_v24 }
  0xf4   :  { %1749 = vrsqrt.f32 %v102_v26  ;;  %vm125_vm2 = vcmp.eq.f32.partialorder %v102_v26, inf  ;;  %v128_v39 = vand.u32 2147483648, %v102_v26  ;;  %vm127_vm3 = vcmp.eq.f32.partialorder %v102_v26, 0.0 }
  0xf9   :  { %v97_v27 = vpop.xlane.xlu1 %96 }
  0xfa   :  { %v1750_v28 = vpop.eup %1749  ;;  %v101_v29 = vmul.f32 0.032258064, %v97_v27 }
  0xfb   :  { %v119_v30 = vmul.f32 %v1750_v28, %v102_v26 }
  0xfc   :  { %1751 = vrsqrt.f32 %v101_v29  ;;  %vm113_vm4 = vcmp.eq.f32.partialorder %v101_v29, inf  ;;  %v116_v47 = vand.u32 2147483648, %v101_v29  ;;  %vm115_vm5 = vcmp.eq.f32.partialorder %v101_v29, 0.0 }
  0xfd   :  { %v120_v31 = vmul.f32 %v1750_v28, %v119_v30 }
  0xff   :  { %v121_v32 = vmul.f32 0.5, %v120_v31 }
 0x101   :  { %v122_v33 = vsub.f32 1.5, %v121_v32 }
 0x102   :  { %v1752_v34 = vpop.eup %1751 }
 0x103   :  { %v123_v35 = vmul.f32 %v1750_v28, %v122_v33  ;;  %v107_v36 = vmul.f32 %v1752_v34, %v101_v29 }
 0x105   :  { %v124_v37 = vmul.f32 %v123_v35, %v102_v26  ;;  %v108_v38 = vmul.f32 %v1752_v34, %v107_v36 }
 0x107   :  { %v109_v40 = vmul.f32 0.5, %v108_v38  ;;  %v126_v41 = vsel %vm125_vm2, %v102_v26, %v124_v37  ;;  %v2023_v37 = vld [vmem:[%s2499_s2] sm:$0xff] }
 0x108   :  { %v129_v42 = vsel %vm127_vm3, %v128_v39, %v126_v41  ;;  %v2030_v41 = vld [vmem:[%s2499_s2 + $0x8] sm:$0xff]  ;;  %s1871_s2 = smov 56  }
 0x109   :  { %v110_v43 = vsub.f32 1.5, %v109_v40  ;;  %v131_v44 = vadd.f32 1e-06, %v129_v42 }
 0x10b   :  { %v111_v45 = vmul.f32 %v1752_v34, %v110_v43  ;;  %1753 = vrcp.f32 %v131_v44  ;;  %v158_v54 = vand.u32 2147483648, %v131_v44  ;;  %v156_v57 = vand.u32 2147483647, %v131_v44 }
 0x10c   :  { %vm152_vm7 = vweird.f32 %v131_v44 }
 0x10d   :  { %v112_v46 = vmul.f32 %v111_v45, %v101_v29  ;;  %v159_v60 = vor.u32 1.1754944e-38, %v158_v54  ;;  %vm157_vm9 = vcmp.eq.f32.partialorder %v156_v57, 8.507059e+37 }
 0x10f   :  { %v114_v48 = vsel %vm113_vm4, %v101_v29, %v112_v46 }
 0x110   :  { %v117_v49 = vsel %vm115_vm5, %v116_v47, %v114_v48 }
 0x111   :  { %v1754_v50 = vpop.eup %1753  ;;  %v130_v51 = vadd.f32 1e-06, %v117_v49 }
 0x112   :  { %v148_v52 = vmul.f32 %v1754_v50, %v131_v44  ;;  %vm153_vm6 = vweird.f32 %v1754_v50 }
 0x113   :  { %1755 = vrcp.f32 %v130_v51  ;;  %vm154_vm8 = vmor %vm152_vm7, %vm153_vm6  ;;  %v143_v6 = vand.u32 2147483648, %v130_v51  ;;  %v141_v9 = vand.u32 2147483647, %v130_v51  ;;  %vm137_vm11 = vweird.f32 %v130_v51 }
 0x114   :  { %v149_v53 = vsub.f32 1.0, %v148_v52 }
 0x115   :  { %v144_v12 = vor.u32 1.1754944e-38, %v143_v6  ;;  %vm142_vm13 = vcmp.eq.f32.partialorder %v141_v9, 8.507059e+37 }
 0x116   :  { %v150_v56 = vmul.f32 %v1754_v50, %v149_v53 }
 0x118   :  { %v151_v58 = vadd.f32 %v1754_v50, %v150_v56 }
 0x119   :  { %v1756_v59 = vpop.eup %1755 }
 0x11a   :  { %v155_v62 = vsel %vm154_vm8, %v1754_v50, %v151_v58  ;;  %v133_v1 = vmul.f32 %v1756_v59, %v130_v51  ;;  %vm138_vm10 = vweird.f32 %v1756_v59 }
 0x11b   :  { %v160_v3 = vsel %vm157_vm9, %v159_v60, %v155_v62  ;;  %vm139_vm12 = vmor %vm137_vm11, %vm138_vm10 }
 0x11c   :  { %v161_v4 = vmul.f32 %v160_v3, %v105_v61  ;;  %v134_v5 = vsub.f32 1.0, %v133_v1 }
 0x11e   :  { %v164_v7 = vadd.f32 %v1735_v63, %v161_v4  ;;  %v135_v8 = vmul.f32 %v1756_v59, %v134_v5 }
 0x120   :  { %1612 = vmatmul.msk.f32.vlgmr.msra.gmra.mxu3 %vm75_vm0, %v164_v7  ;;  %v136_v11 = vadd.f32 %v1756_v59, %v135_v8 }
 0x122   :  { %v140_v14 = vsel %vm139_vm12, %v1756_v59, %v136_v11 }
 0x123   :  { %v145_v15 = vsel %vm142_vm13, %v144_v12, %v140_v14 }
 0x124   :  { %v146_v16 = vmul.f32 %v145_v15, %v104_v13 }
 0x126   :  { %v163_v17 = vadd.f32 %v1735_v63, %v146_v16 }
 0x128   :  { %1611 = vmatmul.msk.f32.vlgmr.msra.gmra.mxu0 %vm75_vm0, %v163_v17 }
 0x1a3   :  { %v192_v20 = vpop.f32.mrf.mxu3 }
 0x1a4   :  { %v1970_v21 = vadd.f32 %v1736_v19, %v192_v20 }
 0x1a5   :  { %v189_v22 = vpop.f32.mrf.mxu0 }
 0x1a6   :  { %v1972_v23 = vadd.f32 %v1736_v19, %v189_v22  ;;  %323 = vrot.lane.b32.xlu0 %v1970_v21, %s1864_s14  ;;  %199 = vrot.lane.b32.xlu2 %v1970_v21, %s1865_s15 }
 0x1a8   :  { %321 = vrot.lane.b32.xlu1 %v1972_v23, %s1864_s14  ;;  %v2048_v63 = vpack.i.bf16 %v1972_v23, %v1970_v21 }
 0x1ae   :  { %565 = vrot.lane.b32.xlu0 %v1972_v23, %s1866_s16  ;;  %197 = vrot.lane.b32.xlu2 %v1972_v23, %s1865_s15 }
 0x1b0   :  { %445 = vrot.lane.b32.xlu1 %v1970_v21, %s1867_s17 }
 0x1b6   :  { %443 = vrot.lane.b32.xlu0 %v1972_v23, %s1867_s17  ;;  %317 = vrot.lane.b32.xlu2 %v1972_v23, %s1868_s18 }
 0x1b8   :  { %439 = vrot.lane.b32.xlu1 %v1972_v23, %s1869_s19 }
 0x1be   :  { %441 = vrot.lane.b32.xlu0 %v1970_v21, %s1869_s19  ;;  %319 = vrot.lane.b32.xlu2 %v1970_v21, %s1868_s18 }
 0x1c6   :  { %567 = vrot.lane.b32.xlu2 %v1970_v21, %s1866_s16 }
 0x1ce   :  { %561 = vrot.lane.b32.xlu2 %v1972_v23, %s1870_s20 }
 0x1d6   :  { %563 = vrot.lane.b32.xlu2 %v1970_v21, %s1870_s20 }
 0x200   :  { %v200_v18 = vpop.permute.xlu2 %199 }
 0x201   :  { %1613 = vmatpush.xpose.msk.msra.mxu1 %vm201_vm14, %v200_v18 }
 0x208   :  { %v198_v24 = vpop.permute.xlu2 %197 }
 0x209   :  { %1614 = vmatpush.xpose.msk.msra.mxu1 %vm201_vm14, %v198_v24 }
 0x20c   :  { %1615 = vmatmul.msk.f32.vlgmr.msra.gmra.mxu1 %vm201_vm14, %v1972_v23 }
 0x210   :  { %v318_v25 = vpop.permute.xlu2 %317 }
 0x214   :  { %1616 = vmatmul.msk.f32.gmra.mxu1 %vm201_vm14, %v1970_v21 }
 0x218   :  { %v324_v26 = vpop.permute.xlu0 %323  ;;  %v320_v27 = vpop.permute.xlu2 %319 }
 0x219   :  { %1619 = vmatpush.xpose.msk.msrb.mxu3 %vm201_vm14, %v324_v26 }
 0x21a   :  { %v322_v28 = vpop.permute.xlu1 %321 }
 0x21d   :  { %1620 = vmatpush.xpose.msk.msrb.mxu3 %vm201_vm14, %v322_v28 }
 0x220   :  { %v566_v29 = vpop.permute.xlu0 %565  ;;  %1621 = vmatmul.msk.f32.vlgmr.msrb.gmra.mxu3 %vm201_vm14, %v318_v25  ;;  %v568_v30 = vpop.permute.xlu2 %567 }
 0x221   :  { %1631 = vmatpush.xpose.msk.msra.mxu3 %vm201_vm14, %v568_v30 }
 0x222   :  { %v446_v31 = vpop.permute.xlu1 %445 }
 0x223   :  { %1625 = vmatpush.xpose.msk.msrb.mxu0 %vm201_vm14, %v446_v31 }
 0x225   :  { %1632 = vmatpush.xpose.msk.msra.mxu3 %vm201_vm14, %v566_v29 }
 0x228   :  { %v444_v32 = vpop.permute.xlu0 %443  ;;  %1622 = vmatmul.msk.f32.gmra.mxu3 %vm201_vm14, %v320_v27  ;;  %v562_v34 = vpop.permute.xlu2 %561 }
 0x229   :  { %1626 = vmatpush.xpose.msk.msrb.mxu0 %vm201_vm14, %v444_v32 }
 0x22a   :  { %v440_v33 = vpop.permute.xlu1 %439 }
 0x22c   :  { %1627 = vmatmul.msk.f32.vlgmr.msrb.gmra.mxu0 %vm201_vm14, %v440_v33 }
 0x230   :  { %1633 = vmatmul.msk.f32.vlgmr.msra.gmra.mxu3 %vm201_vm14, %v562_v34  ;;  %v442_v35 = vpop.permute.xlu0 %441  ;;  %v564_v36 = vpop.permute.xlu2 %563 }
 0x234   :  { %1628 = vmatmul.msk.f32.gmra.mxu0 %vm201_vm14, %v442_v35 }
 0x238   :  { %1634 = vmatmul.msk.f32.gmra.mxu3 %vm201_vm14, %v564_v36 }
 0x289   :  { %v227_v38 = vpop.f32.mrf.mxu1 }
 0x28a   :  { %v228_v39 = vadd.f32 %v227_v38, %v2023_v37 }
 0x28c   :  { %v234_v40 = vsel %vm233_vm15, %v228_v39, -inf }
 0x28d   :  { %235 = vmax.xlane.f32.xlu2 %v234_v40 }
 0x291   :  { %v230_v42 = vpop.f32.mrf.mxu1 }
 0x292   :  { %v231_v43 = vadd.f32 %v230_v42, %v2030_v41 }
 0x294   :  { %v237_v44 = vsel %vm233_vm15, %v231_v43, -inf }
 0x295   :  { %238 = vmax.xlane.f32.xlu1 %v237_v44 }
 0x2a3   :  { %v350_v45 = vpop.f32.mrf.mxu3 }
 0x2a4   :  { %v351_v46 = vadd.f32 %v350_v45, %v2023_v37 }
 0x2a6   :  { %v356_v47 = vsel %vm233_vm15, %v351_v46, -inf }
 0x2a7   :  { %357 = vmax.xlane.f32.xlu0 %v356_v47 }
 0x2a9   :  { %v472_v48 = vpop.f32.mrf.mxu0 }
 0x2aa   :  { %v473_v49 = vadd.f32 %v472_v48, %v2023_v37 }
 0x2ab   :  { %v353_v50 = vpop.f32.mrf.mxu3 }
 0x2ac   :  { %v354_v51 = vadd.f32 %v353_v50, %v2030_v41  ;;  %v478_v52 = vsel %vm233_vm15, %v473_v49, -inf }
 0x2ae   :  { %v359_v53 = vsel %vm233_vm15, %v354_v51, -inf }
 0x2af   :  { %479 = vmax.xlane.f32.xlu0 %v478_v52  ;;  %360 = vmax.xlane.f32.xlu2 %v359_v53 }
 0x2b1   :  { %v475_v54 = vpop.f32.mrf.mxu0 }
 0x2b2   :  { %v476_v55 = vadd.f32 %v475_v54, %v2030_v41 }
 0x2b3   :  { %v594_v56 = vpop.f32.mrf.mxu3 }
 0x2b4   :  { %v481_v57 = vsel %vm233_vm15, %v476_v55, -inf  ;;  %v595_v58 = vadd.f32 %v594_v56, %v2023_v37 }
 0x2b5   :  { %482 = vmax.xlane.f32.xlu1 %v481_v57 }
 0x2b6   :  { %v600_v61 = vsel %vm233_vm15, %v595_v58, -inf }
 0x2bb   :  { %v597_v59 = vpop.f32.mrf.mxu3 }
 0x2bc   :  { %v598_v60 = vadd.f32 %v597_v59, %v2030_v41 }
 0x2bd   :  { %601 = vmax.xlane.f32.xlu1 %v600_v61 }
 0x2be   :  { %v603_v62 = vsel %vm233_vm15, %v598_v60, -inf }
 0x2bf   :  { %604 = vmax.xlane.f32.xlu2 %v603_v62 }
 0x2d7   :  { %1700 = vrot.lane.b32.xlu2 %v2048_v63, %s1871_s2  ;;  %s1599_s2 = sshll.u32 %s2503_s6, 4  ;;  %s1600_s2 = int_to_ptr.hbm [resolvable:$true] %s1599_s2 }
 0x300   :  { %v236_v1 = vpop.xlane.xlu2 %235 }
 0x301   :  { %v240_v3 = vsub.f32 %v228_v39, %v236_v1 }
 0x303   :  { %v242_v4 = vmul.f32 1.442695, %v240_v3 }
 0x305   :  { %1757 = vpow2.f32 %v242_v4 }
 0x308   :  { %v239_v5 = vpop.xlane.xlu1 %238 }
 0x309   :  { %v241_v6 = vsub.f32 %v231_v43, %v239_v5 }
 0x30b   :  { %v2051_v7 = vpop.eup %1757  ;;  %v244_v8 = vmul.f32 1.442695, %v241_v6 }
 0x30c   :  { %v246_v9 = vsel %vm233_vm15, %v2051_v7, 0.0 }
 0x30d   :  { %1759 = vpow2.f32 %v244_v8  ;;  %247 = vadd.xlane.f32.xlu0 %v246_v9 }
 0x313   :  { %v2055_v11 = vpop.eup %1759 }
 0x314   :  { %v249_v12 = vsel %vm233_vm15, %v2055_v11, 0.0 }
 0x315   :  { %250 = vadd.xlane.f32.xlu2 %v249_v12 }
 0x31a   :  { %v358_v13 = vpop.xlane.xlu0 %357 }
 0x31b   :  { %v362_v19 = vsub.f32 %v351_v46, %v358_v13 }
 0x31d   :  { %v364_v23 = vmul.f32 1.442695, %v362_v19 }
 0x321   :  { %1695 = vrot.lane.b32.xlu0 %v2048_v63, %s1872_s0  ;;  %s1878_s0 = smov [#allocation2]  }
 0x322   :  { %v480_v14 = vpop.xlane.xlu0 %479  ;;  %v361_v15 = vpop.xlane.xlu2 %360 }
 0x323   :  { %v484_v16 = vsub.f32 %v473_v49, %v480_v14  ;;  %v363_v17 = vsub.f32 %v354_v51, %v361_v15 }
 0x325   :  { %v486_v20 = vmul.f32 1.442695, %v484_v16  ;;  %v366_v21 = vmul.f32 1.442695, %v363_v17 }
 0x327   :  { %1761 = vpow2.f32 %v486_v20 }
 0x328   :  { %1763 = vpow2.f32 %v366_v21  ;;  %v483_v22 = vpop.xlane.xlu1 %482 }
 0x329   :  { %1765 = vpow2.f32 %v364_v23  ;;  %v485_v31 = vsub.f32 %v476_v55, %v483_v22 }
 0x32b   :  { %v488_v34 = vmul.f32 1.442695, %v485_v31 }
 0x32d   :  { %v2060_v18 = vpop.eup %1761 }
 0x32e   :  { %v2062_v24 = vpop.eup %1763  ;;  %v490_v25 = vsel %vm233_vm15, %v2060_v18, 0.0 }
 0x32f   :  { %491 = vadd.xlane.f32.xlu1 %v490_v25  ;;  %v371_v26 = vsel %vm233_vm15, %v2062_v24, 0.0  ;;  %v2068_v29 = vpop.eup %1765 }
 0x330   :  { %372 = vadd.xlane.f32.xlu2 %v371_v26  ;;  %v602_v27 = vpop.xlane.xlu1 %601  ;;  %v368_v33 = vsel %vm233_vm15, %v2068_v29, 0.0 }
 0x331   :  { %v606_v28 = vsub.f32 %v595_v58, %v602_v27 }
 0x332   :  { %v605_v32 = vpop.xlane.xlu2 %604 }
 0x333   :  { %v608_v30 = vmul.f32 1.442695, %v606_v28  ;;  %v607_v35 = vsub.f32 %v598_v60, %v605_v32 }
 0x335   :  { %1767 = vpow2.f32 %v608_v30  ;;  %v610_v38 = vmul.f32 1.442695, %v607_v35 }
 0x336   :  { %1769 = vpow2.f32 %v488_v34 }
 0x337   :  { %369 = vadd.xlane.f32.xlu1 %v368_v33  ;;  %1771 = vpow2.f32 %v610_v38 }
 0x33a   :  { %v1701_v45 = vpop.permute.xlu2 %1700 }
 0x33b   :  { %v2072_v36 = vpop.eup %1767  ;;  %v1702_v8 = vunpack.i.l.bf16 %v1701_v45  ;;  %v1703_v13 = vunpack.i.h.bf16 %v1701_v45 }
 0x33c   :  { %v612_v39 = vsel %vm233_vm15, %v2072_v36, 0.0  ;;  %v2076_v40 = vpop.eup %1769 }
 0x33d   :  { %v493_v42 = vsel %vm233_vm15, %v2076_v40, 0.0  ;;  %v2080_v43 = vpop.eup %1771 }
 0x33e   :  { %v615_v44 = vsel %vm233_vm15, %v2080_v43, 0.0 }
 0x33f   :  { %613 = vadd.xlane.f32.xlu1 %v612_v39 }
 0x347   :  { %494 = vadd.xlane.f32.xlu1 %v493_v42 }
 0x348   :  { %1710 = vrot.lane.b32.xlu2 %v2048_v63, %s1873_s25 }
 0x34b   :  { %616 = vadd.xlane.f32.xlu0 %v615_v44 }
 0x360   :  { %1705 = vrot.lane.b32.xlu1 %v2048_v63, %s1874_s26 }
 0x380   :  { %v248_v46 = vpop.xlane.xlu0 %247 }
 0x381   :  { %1773 = vrcp.f32 %v248_v46  ;;  %v263_v52 = vand.u32 2147483648, %v248_v46  ;;  %vm257_vm2 = vweird.f32 %v248_v46  ;;  %v261_v55 = vand.u32 2147483647, %v248_v46 }
 0x383   :  { %v264_v58 = vor.u32 1.1754944e-38, %v263_v52  ;;  %vm262_vm4 = vcmp.eq.f32.partialorder %v261_v55, 8.507059e+37 }
 0x387   :  { %v1774_v47 = vpop.eup %1773 }
 0x388   :  { %v253_v48 = vmul.f32 %v1774_v47, %v248_v46  ;;  %v251_v49 = vpop.xlane.xlu2 %250  ;;  %vm258_vm1 = vweird.f32 %v1774_v47 }
 0x389   :  { %1775 = vrcp.f32 %v251_v49  ;;  %vm259_vm3 = vmor %vm257_vm2, %vm258_vm1  ;;  %v278_v1 = vand.u32 2147483648, %v251_v49  ;;  %vm272_vm6 = vweird.f32 %v251_v49  ;;  %v276_v6 = vand.u32 2147483647, %v251_v49 }
 0x38a   :  { %v254_v50 = vsub.f32 1.0, %v253_v48 }
 0x38b   :  { %v279_v12 = vor.u32 1.1754944e-38, %v278_v1  ;;  %vm277_vm8 = vcmp.eq.f32.partialorder %v276_v6, 8.507059e+37 }
 0x38c   :  { %v255_v51 = vmul.f32 %v1774_v47, %v254_v50 }
 0x38e   :  { %v256_v53 = vadd.f32 %v1774_v47, %v255_v51 }
 0x38f   :  { %v1776_v54 = vpop.eup %1775 }
 0x390   :  { %v268_v56 = vmul.f32 %v1776_v54, %v251_v49  ;;  %v260_v57 = vsel %vm259_vm3, %v1774_v47, %v256_v53  ;;  %vm273_vm5 = vweird.f32 %v1776_v54 }
 0x391   :  { %v265_v63 = vsel %vm262_vm4, %v264_v58, %v260_v57  ;;  %vm274_vm7 = vmor %vm272_vm6, %vm273_vm5 }
 0x392   :  { %v269_v59 = vsub.f32 1.0, %v268_v56  ;;  %v266_v5 = vmul.f32 %v2051_v7, %v265_v63 }
 0x393   :  { %v1696_v60 = vpop.permute.xlu0 %1695 }
 0x394   :  { %v270_v61 = vmul.f32 %v1776_v54, %v269_v59  ;;  %v1697_v62 = vunpack.i.l.bf16 %v1696_v60  ;;  %v1698_v3 = vunpack.i.h.bf16 %v1696_v60 }
 0x396   :  { %308 = vmatpush.msra.mxu2 %v1697_v62  ;;  %v271_v4 = vadd.f32 %v1776_v54, %v270_v61 }
 0x398   :  { %309 = vmatpush.msra.mxu2 %v1698_v3  ;;  %v275_v9 = vsel %vm274_vm7, %v1776_v54, %v271_v4 }
 0x399   :  { %1617 = vmatmul.msk.f32.vlgmr.msra.gmra.mxu2 %vm233_vm15, %v266_v5  ;;  %v280_v14 = vsel %vm277_vm8, %v279_v12, %v275_v9 }
 0x39a   :  { %430 = vmatpush.msrb.mxu2 %v1702_v8  ;;  %v281_v15 = vmul.f32 %v2055_v11, %v280_v14 }
 0x39c   :  { %431 = vmatpush.msrb.mxu2 %v1703_v13 }
 0x3a1   :  { %1618 = vmatmul.msk.f32.gmra.mxu2 %vm233_vm15, %v281_v15 }
 0x3a2   :  { %v492_v16 = vpop.xlane.xlu1 %491 }
 0x3a3   :  { %1777 = vrcp.f32 %v492_v16  ;;  %v373_v7 = vpop.xlane.xlu2 %372  ;;  %v507_v26 = vand.u32 2147483648, %v492_v16  ;;  %v505_v30 = vand.u32 2147483647, %v492_v16  ;;  %vm501_vm10 = vweird.f32 %v492_v16 }
 0x3a4   :  { %1779 = vrcp.f32 %v373_v7  ;;  %v400_v55 = vand.u32 2147483648, %v373_v7  ;;  %vm394_vm5 = vweird.f32 %v373_v7  ;;  %v398_v57 = vand.u32 2147483647, %v373_v7 }
 0x3a5   :  { %v508_v33 = vor.u32 1.1754944e-38, %v507_v26  ;;  %vm506_vm12 = vcmp.eq.f32.partialorder %v505_v30, 8.507059e+37 }
 0x3a6   :  { %v401_v61 = vor.u32 1.1754944e-38, %v400_v55  ;;  %vm399_vm7 = vcmp.eq.f32.partialorder %v398_v57, 8.507059e+37 }
 0x3a9   :  { %v1778_v17 = vpop.eup %1777 }
 0x3aa   :  { %v497_v19 = vmul.f32 %v1778_v17, %v492_v16  ;;  %v370_v20 = vpop.xlane.xlu1 %369  ;;  %v1780_v21 = vpop.eup %1779  ;;  %vm502_vm9 = vweird.f32 %v1778_v17 }
 0x3ab   :  { %1781 = vrcp.f32 %v370_v20  ;;  %v1711_v22 = vpop.permute.xlu2 %1710  ;;  %v390_v28 = vmul.f32 %v1780_v21, %v373_v7  ;;  %vm503_vm11 = vmor %vm501_vm10, %vm502_vm9  ;;  %v385_v45 = vand.u32 2147483648, %v370_v20  ;;  %v383_v49 = vand.u32 2147483647, %v370_v20 }
 0x3ac   :  { %v498_v23 = vsub.f32 1.0, %v497_v19  ;;  %v1712_v25 = vunpack.i.l.bf16 %v1711_v22  ;;  %v1713_v11 = vunpack.i.h.bf16 %v1711_v22  ;;  %vm379_vm1 = vweird.f32 %v370_v20 }
 0x3ad   :  { %v391_v34 = vsub.f32 1.0, %v390_v28  ;;  %v386_v51 = vor.u32 1.1754944e-38, %v385_v45  ;;  %vm384_vm3 = vcmp.eq.f32.partialorder %v383_v49, 8.507059e+37  ;;  %vm395_vm4 = vweird.f32 %v1780_v21  ;;  %v46_v49 = vld [vmem:[%s2500_s3 + $0x98] sm:$0xff] }
 0x3ae   :  { %v499_v27 = vmul.f32 %v1778_v17, %v498_v23  ;;  %552 = vmatpush.msrb.mxu1 %v1712_v25  ;;  %vm396_vm6 = vmor %vm394_vm5, %vm395_vm4  ;;  %733 = vmatpush.msra.mxu0 %v46_v49 }
 0x3af   :  { %v392_v47 = vmul.f32 %v1780_v21, %v391_v34 }
 0x3b0   :  { %v500_v31 = vadd.f32 %v1778_v17, %v499_v27  ;;  %553 = vmatpush.msrb.mxu1 %v1713_v11 }
 0x3b1   :  { %v1782_v32 = vpop.eup %1781  ;;  %v393_v54 = vadd.f32 %v1780_v21, %v392_v47 }
 0x3b2   :  { %v375_v35 = vmul.f32 %v1782_v32, %v370_v20  ;;  %v2090_v38 = vpop.xlane.xlu1 %613  ;;  %v504_v39 = vsel %vm503_vm11, %v1778_v17, %v500_v31  ;;  %vm380_vm13 = vweird.f32 %v1782_v32 }
 0x3b3   :  { %v509_v44 = vsel %vm506_vm12, %v508_v33, %v504_v39  ;;  %1783 = vrcp.f32 %v2090_v38  ;;  %vm381_vm2 = vmor %vm379_vm1, %vm380_vm13  ;;  %v397_v60 = vsel %vm396_vm6, %v1780_v21, %v393_v54  ;;  %v629_v21 = vand.u32 2147483648, %v2090_v38 }
 0x3b4   :  { %v376_v42 = vsub.f32 1.0, %v375_v35  ;;  %v510_v46 = vmul.f32 %v2060_v18, %v509_v44  ;;  %v402_v1 = vsel %vm399_vm7, %v401_v61, %v397_v60  ;;  %vm623_vm13 = vweird.f32 %v2090_v38 }
 0x3b5   :  { %v403_v6 = vmul.f32 %v2062_v24, %v402_v1  ;;  %v627_v22 = vand.u32 2147483647, %v2090_v38  ;;  %v630_v26 = vor.u32 1.1754944e-38, %v629_v21  ;;  %vm711_vm7 = vcmask 195584   ;;  %v1737_v1 = vld [vmem:[%s2502_s5 + $0x1] ss:$0 sm:$0xff] }
 0x3b6   :  { %v377_v48 = vmul.f32 %v1782_v32, %v376_v42  ;;  %1629 = vmatmul.msk.f32.vlgmr.msrb.gmra.mxu1 %vm233_vm15, %v510_v46 }
 0x3b8   :  { %v378_v50 = vadd.f32 %v1782_v32, %v377_v48 }
 0x3b9   :  { %v1784_v58 = vpop.eup %1783 }
 0x3ba   :  { %v495_v52 = vpop.xlane.xlu1 %494  ;;  %v382_v53 = vsel %vm381_vm2, %v1782_v32, %v378_v50  ;;  %v619_v62 = vmul.f32 %v1784_v58, %v2090_v38  ;;  %vm624_vm12 = vweird.f32 %v1784_v58  ;;  %vm628_vm2 = vcmp.eq.f32.partialorder %v627_v22, 8.507059e+37  ;;  %v45_v50 = vld [vmem:[%s2500_s3 + $0x68] sm:$0xff] }
 0x3bb   :  { %1785 = vrcp.f32 %v495_v52  ;;  %v387_v18 = vsel %vm384_vm3, %v386_v51, %v382_v53  ;;  %v522_v8 = vand.u32 2147483648, %v495_v52  ;;  %v520_v12 = vand.u32 2147483647, %v495_v52  ;;  %vm625_vm1 = vmor %vm623_vm13, %vm624_vm12  ;;  %v44_v51 = vld [vmem:[%s2500_s3 + $0x38] sm:$0xff]  ;;  %734 = vmatpush.msra.mxu0 %v45_v50 }
 0x3bc   :  { %v388_v56 = vmul.f32 %v2068_v29, %v387_v18  ;;  %v620_v4 = vsub.f32 1.0, %v619_v62  ;;  %vm516_vm9 = vweird.f32 %v495_v52 }
 0x3bd   :  { %v523_v16 = vor.u32 1.1754944e-38, %v522_v8  ;;  %vm521_vm11 = vcmp.eq.f32.partialorder %v520_v12, 8.507059e+37  ;;  %735 = vmatpush.msra.mxu0 %v44_v51 }
 0x3be   :  { %v617_v59 = vpop.xlane.xlu0 %616  ;;  %1623 = vmatmul.msk.f32.vlgmr.msrb.gmra.mxu2 %vm233_vm15, %v388_v56  ;;  %v621_v13 = vmul.f32 %v1784_v58, %v620_v4 }
 0x3bf   :  { %1787 = vrcp.f32 %v617_v59  ;;  %v644_v31 = vand.u32 2147483648, %v617_v59  ;;  %vm638_vm4 = vweird.f32 %v617_v59  ;;  %v642_v33 = vand.u32 2147483647, %v617_v59 }
 0x3c0   :  { %v622_v19 = vadd.f32 %v1784_v58, %v621_v13  ;;  %v54_v13 = vld [vmem:[%s2500_s3 + $0xa8] sm:$0xff] }
 0x3c1   :  { %v1786_v63 = vpop.eup %1785  ;;  %v645_v35 = vor.u32 1.1754944e-38, %v644_v31  ;;  %vm643_vm6 = vcmp.eq.f32.partialorder %v642_v33, 8.507059e+37  ;;  %877 = vmatpush.msrb.mxu3 %v54_v13  ;;  %v47_v31 = vld [vmem:[%s2500_s3 + $0x10] sm:$0xff] }
 0x3c2   :  { %v512_v3 = vmul.f32 %v1786_v63, %v495_v52  ;;  %vm517_vm8 = vweird.f32 %v1786_v63  ;;  %v626_v23 = vsel %vm625_vm1, %v1784_v58, %v622_v19  ;;  %v43_v52 = vld [vmem:[%s2500_s3 + $0x8] sm:$0xff] }
 0x3c3   :  { %vm518_vm10 = vmor %vm516_vm9, %vm517_vm8  ;;  %v631_v28 = vsel %vm628_vm2, %v630_v26, %v626_v23  ;;  %736 = vmatpush.msra.mxu0 %v43_v52  ;;  %v51_v23 = vld [vmem:[%s2500_s3 + $0x18] sm:$0xff]  ;;  %v74_v26 = vld [vmem:[%s2498_s1 + $0x8] sm:$0xff] }
 0x3c4   :  { %v513_v5 = vsub.f32 1.0, %v512_v3  ;;  %v632_v32 = vmul.f32 %v2072_v36, %v631_v28  ;;  %v49_v28 = vld [vmem:[%s2500_s3 + $0x70] sm:$0xff] }
 0x3c5   :  { %v1788_v29 = vpop.eup %1787 }
 0x3c6   :  { %v514_v9 = vmul.f32 %v1786_v63, %v513_v5  ;;  %1624 = vmatmul.msk.f32.gmra.mxu2 %vm233_vm15, %v403_v6  ;;  %v634_v14 = vmul.f32 %v1788_v29, %v617_v59  ;;  %vm639_vm3 = vweird.f32 %v1788_v29 }
 0x3c7   :  { %vm640_vm5 = vmor %vm638_vm4, %vm639_vm3 }
 0x3c8   :  { %v515_v15 = vadd.f32 %v1786_v63, %v514_v9  ;;  %v635_v20 = vsub.f32 1.0, %v634_v14  ;;  %v52_v14 = vld [vmem:[%s2500_s3 + $0x48] sm:$0xff] }
 0x3ca   :  { %v519_v7 = vsel %vm518_vm10, %v1786_v63, %v515_v15  ;;  %v636_v25 = vmul.f32 %v1788_v29, %v635_v20 }
 0x3cb   :  { %v524_v17 = vsel %vm521_vm11, %v523_v16, %v519_v7 }
 0x3cc   :  { %v525_v24 = vmul.f32 %v2076_v40, %v524_v17  ;;  %v637_v30 = vadd.f32 %v1788_v29, %v636_v25  ;;  %v73_v25 = vld [vmem:[%s2498_s1] sm:$0xff] }
 0x3ce   :  { %1630 = vmatmul.msk.f32.gmra.mxu1 %vm233_vm15, %v525_v24  ;;  %v641_v34 = vsel %vm640_vm5, %v1788_v29, %v637_v30 }
 0x3cf   :  { %v646_v38 = vsel %vm643_vm6, %v645_v35, %v641_v34 }
 0x3d0   :  { %v647_v39 = vmul.f32 %v2080_v43, %v646_v38 }
 0x3d2   :  { %v1706_v27 = vpop.permute.xlu1 %1705 }
 0x3d3   :  { %v1707_v11 = vunpack.i.l.bf16 %v1706_v27  ;;  %v1708_v40 = vunpack.i.h.bf16 %v1706_v27  ;;  %v50_v27 = vld [vmem:[%s2500_s3 + $0xa0] sm:$0xff] }
 0x3d4   :  { %847 = vmatpush.msra.mxu1 %v50_v27  ;;  %v1740_v27 = vld [vmem:[%s2502_s5 + $0x3] ss:$0 sm:$0xff] }
 0x3d5   :  { %674 = vmatpush.msra.mxu2 %v1707_v11  ;;  %v48_v11 = vld [vmem:[%s2500_s3 + $0x40] sm:$0xff] }
 0x3d6   :  { %848 = vmatpush.msra.mxu1 %v49_v28 }
 0x3d7   :  { %675 = vmatpush.msra.mxu2 %v1708_v40 }
 0x3d8   :  { %1635 = vmatmul.msk.f32.vlgmr.msra.gmra.mxu2 %vm233_vm15, %v632_v32  ;;  %849 = vmatpush.msra.mxu1 %v48_v11 }
 0x3da   :  { %850 = vmatpush.msra.mxu1 %v47_v31 }
 0x3e0   :  { %1636 = vmatmul.msk.f32.gmra.mxu2 %vm233_vm15, %v647_v39 }
 0x41c   :  { %v311_v42 = vpop.f32.mrf.mxu2 }
 0x424   :  { %v314_v45 = vpop.f32.mrf.mxu2 }
 0x433   :  { %v555_v44 = vpop.f32.mrf.mxu1 }
 0x434   :  { %693 = vrot.lane.b32.xlu2 %v555_v44, %s1875_s27 }
 0x441   :  { %v433_v36 = vpop.f32.mrf.mxu2 }
 0x442   :  { %685 = vrot.lane.b32.xlu2 %v433_v36, %s1876_s28 }
 0x449   :  { %v436_v46 = vpop.f32.mrf.mxu2 }
 0x44a   :  { %687 = vrot.lane.b32.xlu2 %v436_v46, %s1876_s28 }
 0x44b   :  { %v558_v47 = vpop.f32.mrf.mxu1 }
 0x44c   :  { %695 = vrot.lane.b32.xlu0 %v558_v47, %s1875_s27 }
 0x45b   :  { %v677_v48 = vpop.f32.mrf.mxu2 }
 0x45c   :  { %701 = vrot.lane.b32.xlu1 %v677_v48, %s1877_s29 }
 0x463   :  { %v680_v43 = vpop.f32.mrf.mxu2 }
 0x464   :  { %703 = vrot.lane.b32.xlu1 %v680_v43, %s1877_s29 }
 0x48e   :  { %v694_v53 = vpop.permute.xlu2 %693 }
 0x49c   :  { %v686_v54 = vpop.permute.xlu2 %685 }
 0x49d   :  { %v707_v55 = vsel %vm201_vm14, %v311_v42, %v686_v54 }
 0x49e   :  { %v709_v18 = vsel %vm233_vm15, %v707_v55, %v694_v53 }
 0x4a4   :  { %v688_v58 = vpop.permute.xlu2 %687 }
 0x4a5   :  { %v708_v60 = vsel %vm201_vm14, %v314_v45, %v688_v58 }
 0x4be   :  { %v696_v59 = vpop.permute.xlu0 %695 }
 0x4bf   :  { %v710_v61 = vsel %vm233_vm15, %v708_v60, %v696_v59 }
 0x4ce   :  { %v702_v56 = vpop.permute.xlu1 %701 }
 0x4cf   :  { %v712_v57 = vsel %vm711_vm7, %v709_v18, %v702_v56 }
 0x4d0   :  { %1637 = vmatmul.msk.f32.vlgmr.msra.gmra.mxu0 %vm75_vm0, %v712_v57 }
 0x4d6   :  { %v704_v62 = vpop.permute.xlu1 %703 }
 0x4d7   :  { %v713_v63 = vsel %vm711_vm7, %v710_v61, %v704_v62  ;;  %v1738_v62 = vld [vmem:[%s2502_s5 + $0x8] ss:$0 sm:$0xff] }
 0x4d8   :  { %1638 = vmatmul.msk.f32.gmra.mxu0 %vm75_vm0, %v713_v63 }
 0x54d   :  { %v738_v3 = vpop.f32.mrf.mxu0 }
 0x54e   :  { %v739_v4 = vadd.f32 %v1737_v1, %v738_v3 }
 0x550   :  { %v2139_v5 = vadd.f32 %v739_v4, %v1925_v2  ;;  %v53_v2 = vld [vmem:[%s2500_s3 + $0x78] sm:$0xff] }
 0x551   :  { %878 = vmatpush.msrb.mxu3 %v53_v2 }
 0x552   :  { %v746_v6 = vsel %vm75_vm0, %v2139_v5, 0.0 }
 0x553   :  { %747 = vadd.xlane.f32.xlu2 %v746_v6  ;;  %879 = vmatpush.msrb.mxu3 %v52_v14 }
 0x555   :  { %v741_v29 = vpop.f32.mrf.mxu0  ;;  %880 = vmatpush.msrb.mxu3 %v51_v23 }
 0x556   :  { %v742_v8 = vadd.f32 %v1737_v1, %v741_v29  ;;  %1641 = vmatmul.msk.f32.vlgmr.msrb.gmra.mxu3 %vm75_vm0, %v73_v25 }
 0x558   :  { %v2144_v9 = vadd.f32 %v742_v8, %v1918_v0 }
 0x55a   :  { %v749_v12 = vsel %vm75_vm0, %v2144_v9, 0.0 }
 0x55b   :  { %750 = vadd.xlane.f32.xlu1 %v749_v12  ;;  %v1739_v12 = vld [vmem:[%s2502_s5 + $0xb] ss:$0 sm:$0xff] }
 0x55e   :  { %1642 = vmatmul.msk.f32.gmra.mxu3 %vm75_vm0, %v74_v26 }
 0x5c6   :  { %v748_v0 = vpop.xlane.xlu2 %747 }
 0x5c7   :  { %v752_v15 = vmul.f32 %v748_v0, %v1929_v10 }
 0x5c9   :  { %v2159_v16 = vsub.f32 %v2139_v5, %v752_v15 }
 0x5cb   :  { %v756_v7 = vmul.f32 %v2159_v16, %v2159_v16  ;;  %v767_v29 = vmul.f32 %v1738_v62, %v2159_v16 }
 0x5cd   :  { %v758_v17 = vsel %vm75_vm0, %v756_v7, 0.0 }
 0x5ce   :  { %759 = vadd.xlane.f32.xlu0 %v758_v17  ;;  %v751_v19 = vpop.xlane.xlu1 %750 }
 0x5cf   :  { %v753_v20 = vmul.f32 %v751_v19, %v1929_v10 }
 0x5d1   :  { %v2166_v24 = vsub.f32 %v2144_v9, %v753_v20 }
 0x5d3   :  { %v757_v21 = vmul.f32 %v2166_v24, %v2166_v24 }
 0x5d5   :  { %v761_v22 = vsel %vm75_vm0, %v757_v21, 0.0  ;;  %v768_v21 = vmul.f32 %v1738_v62, %v2166_v24  ;;  %v1741_v24 = vld [vmem:[%s2502_s5 + $0x2] ss:$0 sm:$0xff] }
 0x5d6   :  { %762 = vadd.xlane.f32.xlu2 %v761_v22 }
 0x5d9   :  { %v882_v28 = vpop.f32.mrf.mxu3 }
 0x5da   :  { %v2207_v11 = vadd.f32 %v1740_v27, %v882_v28 }
 0x5ee   :  { %1018 = vrot.lane.b32.xlu2 %v2207_v11, %s1868_s18 }
 0x641   :  { %v760_v30 = vpop.xlane.xlu0 %759 }
 0x642   :  { %v764_v40 = vmul.f32 0.032258064, %v760_v30  ;;  %v885_v30 = vpop.f32.mrf.mxu3 }
 0x643   :  { %v2211_v31 = vadd.f32 %v1740_v27, %v885_v30 }
 0x644   :  { %1789 = vrsqrt.f32 %v764_v40  ;;  %vm776_vm8 = vcmp.eq.f32.partialorder %v764_v40, inf  ;;  %v779_v48 = vand.u32 2147483648, %v764_v40  ;;  %vm778_vm9 = vcmp.eq.f32.partialorder %v764_v40, 0.0 }
 0x645   :  { %1020 = vrot.lane.b32.xlu1 %v2211_v31, %s1868_s18  ;;  %1142 = vrot.lane.b32.xlu2 %v2211_v31, %s1869_s19 }
 0x646   :  { %1643 = vmatpush.xpose.msk.msrb.mxu2 %vm201_vm14, %v2211_v31 }
 0x649   :  { %v763_v32 = vpop.xlane.xlu2 %762 }
 0x64a   :  { %v1790_v33 = vpop.eup %1789  ;;  %v765_v34 = vmul.f32 0.032258064, %v763_v32  ;;  %1644 = vmatpush.xpose.msk.msrb.mxu2 %vm201_vm14, %v2207_v11 }
 0x64b   :  { %v770_v35 = vmul.f32 %v1790_v33, %v764_v40 }
 0x64c   :  { %1791 = vrsqrt.f32 %v765_v34  ;;  %vm788_vm10 = vcmp.eq.f32.partialorder %v765_v34, inf  ;;  %v791_v55 = vand.u32 2147483648, %v765_v34  ;;  %vm790_vm11 = vcmp.eq.f32.partialorder %v765_v34, 0.0 }
 0x64d   :  { %v771_v38 = vmul.f32 %v1790_v33, %v770_v35  ;;  %1140 = vrot.lane.b32.xlu1 %v2207_v11, %s1869_s19  ;;  %1262 = vrot.lane.b32.xlu2 %v2207_v11, %s1870_s20 }
 0x64f   :  { %v772_v39 = vmul.f32 0.5, %v771_v38 }
 0x651   :  { %v773_v42 = vsub.f32 1.5, %v772_v39  ;;  %v1019_v35 = vpop.permute.xlu2 %1018 }
 0x652   :  { %v1792_v44 = vpop.eup %1791 }
 0x653   :  { %v774_v45 = vmul.f32 %v1790_v33, %v773_v42  ;;  %v782_v36 = vmul.f32 %v1792_v44, %v765_v34 }
 0x655   :  { %v775_v46 = vmul.f32 %v774_v45, %v764_v40  ;;  %v783_v47 = vmul.f32 %v1792_v44, %v782_v36 }
 0x657   :  { %v777_v43 = vsel %vm776_vm8, %v764_v40, %v775_v46  ;;  %v784_v49 = vmul.f32 0.5, %v783_v47 }
 0x658   :  { %v780_v50 = vsel %vm778_vm9, %v779_v48, %v777_v43 }
 0x659   :  { %v793_v51 = vadd.f32 1e-06, %v780_v50  ;;  %v785_v52 = vsub.f32 1.5, %v784_v49 }
 0x65b   :  { %1793 = vrcp.f32 %v793_v51  ;;  %v786_v53 = vmul.f32 %v1792_v44, %v785_v52  ;;  %v806_v61 = vand.u32 2147483648, %v793_v51  ;;  %v804_v1 = vand.u32 2147483647, %v793_v51 }
 0x65c   :  { %vm800_vm13 = vweird.f32 %v793_v51 }
 0x65d   :  { %v787_v54 = vmul.f32 %v786_v53, %v765_v34  ;;  %v807_v6 = vor.u32 1.1754944e-38, %v806_v61  ;;  %vm805_vm2 = vcmp.eq.f32.partialorder %v804_v1, 8.507059e+37 }
 0x65f   :  { %v789_v18 = vsel %vm788_vm10, %v765_v34, %v787_v54 }
 0x660   :  { %v792_v56 = vsel %vm790_vm11, %v791_v55, %v789_v18 }
 0x661   :  { %v1794_v57 = vpop.eup %1793  ;;  %v794_v58 = vadd.f32 1e-06, %v792_v56 }
 0x662   :  { %v796_v59 = vmul.f32 %v1794_v57, %v793_v51  ;;  %vm801_vm12 = vweird.f32 %v1794_v57 }
 0x663   :  { %1795 = vrcp.f32 %v794_v58  ;;  %vm802_vm1 = vmor %vm800_vm13, %vm801_vm12  ;;  %v821_v15 = vand.u32 2147483648, %v794_v58  ;;  %v819_v19 = vand.u32 2147483647, %v794_v58  ;;  %vm815_vm4 = vweird.f32 %v794_v58 }
 0x664   :  { %v797_v60 = vsub.f32 1.0, %v796_v59 }
 0x665   :  { %v822_v16 = vor.u32 1.1754944e-38, %v821_v15  ;;  %vm820_vm6 = vcmp.eq.f32.partialorder %v819_v19, 8.507059e+37  ;;  %v1714_v19 = vpack.i.bf16 %v2207_v11, %v2211_v31 }
 0x666   :  { %v798_v63 = vmul.f32 %v1794_v57, %v797_v60 }
 0x668   :  { %v799_v3 = vadd.f32 %v1794_v57, %v798_v63 }
 0x669   :  { %v1796_v4 = vpop.eup %1795 }
 0x66a   :  { %v803_v8 = vsel %vm802_vm1, %v1794_v57, %v799_v3  ;;  %v811_v13 = vmul.f32 %v1796_v4, %v794_v58  ;;  %vm816_vm3 = vweird.f32 %v1796_v4 }
 0x66b   :  { %v808_v2 = vsel %vm805_vm2, %v807_v6, %v803_v8  ;;  %vm817_vm5 = vmor %vm815_vm4, %vm816_vm3 }
 0x66c   :  { %v809_v14 = vmul.f32 %v808_v2, %v767_v29  ;;  %v812_v0 = vsub.f32 1.0, %v811_v13 }
 0x66e   :  { %v826_v7 = vadd.f32 %v1739_v12, %v809_v14  ;;  %v813_v17 = vmul.f32 %v1796_v4, %v812_v0 }
 0x670   :  { %1639 = vmatmul.msk.f32.vlgmr.msra.gmra.mxu1 %vm75_vm0, %v826_v7  ;;  %v814_v20 = vadd.f32 %v1796_v4, %v813_v17 }
 0x672   :  { %v818_v22 = vsel %vm817_vm5, %v1796_v4, %v814_v20 }
 0x673   :  { %v823_v23 = vsel %vm820_vm6, %v822_v16, %v818_v22 }
 0x674   :  { %v824_v25 = vmul.f32 %v823_v23, %v768_v21 }
 0x676   :  { %v827_v26 = vadd.f32 %v1739_v12, %v824_v25 }
 0x678   :  { %1640 = vmatmul.msk.f32.gmra.mxu1 %vm75_vm0, %v827_v26 }
 0x69f   :  { %v1143_v38 = vpop.permute.xlu2 %1142 }
 0x6a0   :  { %1655 = vmatpush.xpose.msk.msra.mxu2 %vm201_vm14, %v1143_v38 }
 0x6b7   :  { %v1021_v39 = vpop.permute.xlu1 %1020 }
 0x6b8   :  { %1649 = vmatpush.xpose.msk.msrb.mxu1 %vm201_vm14, %v1021_v39 }
 0x6bc   :  { %1650 = vmatpush.xpose.msk.msrb.mxu1 %vm201_vm14, %v1019_v35 }
 0x6bf   :  { %v1141_v42 = vpop.permute.xlu1 %1140 }
 0x6c0   :  { %1656 = vmatpush.xpose.msk.msra.mxu2 %vm201_vm14, %v1141_v42 }
 0x6ed   :  { %v852_v40 = vpop.f32.mrf.mxu1 }
 0x6ee   :  { %v853_v32 = vadd.f32 %v1741_v24, %v852_v40 }
 0x6f0   :  { %1014 = vrot.lane.b32.xlu0 %v853_v32, %s1868_s18  ;;  %1645 = vmatmul.msk.f32.vlgmr.msrb.gmra.mxu2 %vm201_vm14, %v853_v32 }
 0x6f5   :  { %v855_v33 = vpop.f32.mrf.mxu1 }
 0x6f6   :  { %v856_v34 = vadd.f32 %v1741_v24, %v855_v33 }
 0x6f8   :  { %1264 = vrot.lane.b32.xlu0 %v2211_v31, %s1870_s20  ;;  %1138 = vrot.lane.b32.xlu2 %v856_v34, %s1869_s19 }
 0x6f9   :  { %1016 = vrot.lane.b32.xlu1 %v856_v34, %s1868_s18  ;;  %1646 = vmatmul.msk.f32.gmra.mxu2 %vm201_vm14, %v856_v34 }
 0x700   :  { %1136 = vrot.lane.b32.xlu0 %v853_v32, %s1869_s19  ;;  %892 = vrot.lane.b32.xlu2 %v2030_v41, %s1869_s19 }
 0x701   :  { %1258 = vrot.lane.b32.xlu1 %v853_v32, %s1870_s20 }
 0x708   :  { %1260 = vrot.lane.b32.xlu0 %v856_v34, %s1870_s20 }
 0x709   :  { %890 = vrot.lane.b32.xlu1 %v2023_v37, %s1869_s19  ;;  %v1263_v37 = vpop.permute.xlu2 %1262 }
 0x752   :  { %v1139_v47 = vpop.permute.xlu2 %1138 }
 0x75a   :  { %v893_v55 = vpop.permute.xlu2 %892 }
 0x762   :  { %v1015_v41 = vpop.permute.xlu0 %1014 }
 0x763   :  { %1651 = vmatmul.msk.f32.vlgmr.msrb.gmra.mxu1 %vm201_vm14, %v1015_v41 }
 0x76a   :  { %v1265_v44 = vpop.permute.xlu0 %1264 }
 0x76b   :  { %v1017_v45 = vpop.permute.xlu1 %1016  ;;  %1661 = vmatpush.xpose.msk.msra.mxu1 %vm201_vm14, %v1265_v44 }
 0x76c   :  { %1652 = vmatmul.msk.f32.gmra.mxu1 %vm201_vm14, %v1017_v45 }
 0x76f   :  { %1662 = vmatpush.xpose.msk.msra.mxu1 %vm201_vm14, %v1263_v37 }
 0x772   :  { %v1137_v36 = vpop.permute.xlu0 %1136 }
 0x773   :  { %v1259_v46 = vpop.permute.xlu1 %1258  ;;  %1657 = vmatmul.msk.f32.vlgmr.msra.gmra.mxu2 %vm201_vm14, %v1137_v36  ;;  %v925_v43 = vpop.f32.mrf.mxu2 }
 0x774   :  { %1663 = vmatmul.msk.f32.vlgmr.msra.gmra.mxu1 %vm201_vm14, %v1259_v46 }
 0x77a   :  { %v1261_v48 = vpop.permute.xlu0 %1260 }
 0x77b   :  { %v891_v49 = vpop.permute.xlu1 %890  ;;  %1658 = vmatmul.msk.f32.gmra.mxu2 %vm201_vm14, %v1139_v47 }
 0x77c   :  { %1664 = vmatmul.msk.f32.gmra.mxu1 %vm201_vm14, %v1261_v48  ;;  %v926_v50 = vadd.f32 %v925_v43, %v891_v49  ;;  %v928_v18 = vpop.f32.mrf.mxu2 }
 0x77d   :  { %v929_v56 = vadd.f32 %v928_v18, %v893_v55 }
 0x77e   :  { %v931_v51 = vsel %vm233_vm15, %v926_v50, -inf }
 0x77f   :  { %932 = vmax.xlane.f32.xlu1 %v931_v51  ;;  %v934_v59 = vsel %vm233_vm15, %v929_v56, -inf }
 0x7e0   :  { %v1047_v52 = vpop.f32.mrf.mxu1 }
 0x7e1   :  { %v1048_v53 = vadd.f32 %v1047_v52, %v891_v49 }
 0x7e3   :  { %v1053_v54 = vsel %vm233_vm15, %v1048_v53, -inf }
 0x7e4   :  { %1054 = vmax.xlane.f32.xlu0 %v1053_v54 }
 0x7e9   :  { %v1050_v57 = vpop.f32.mrf.mxu1 }
 0x7ea   :  { %v1051_v58 = vadd.f32 %v1050_v57, %v893_v55 }
 0x7ec   :  { %v1056_v60 = vsel %vm233_vm15, %v1051_v58, -inf  ;;  %935 = vmax.xlane.f32.xlu0 %v934_v59 }
 0x7ed   :  { %1057 = vmax.xlane.f32.xlu2 %v1056_v60 }
 0x7f1   :  { %v1291_v63 = vpop.f32.mrf.mxu1 }
 0x7f2   :  { %v933_v61 = vpop.xlane.xlu1 %932  ;;  %v1292_v15 = vadd.f32 %v1291_v63, %v891_v49 }
 0x7f3   :  { %v937_v62 = vsub.f32 %v926_v50, %v933_v61 }
 0x7f4   :  { %v1297_v17 = vsel %vm233_vm15, %v1292_v15, -inf }
 0x7f5   :  { %v939_v1 = vmul.f32 1.442695, %v937_v62 }
 0x7f6   :  { %v1169_v3 = vpop.f32.mrf.mxu2 }
 0x7f7   :  { %1797 = vpow2.f32 %v939_v1  ;;  %v1170_v4 = vadd.f32 %v1169_v3, %v891_v49 }
 0x7f9   :  { %v1175_v6 = vsel %vm233_vm15, %v1170_v4, -inf  ;;  %v1294_v13 = vpop.f32.mrf.mxu1 }
 0x7fa   :  { %1176 = vmax.xlane.f32.xlu2 %v1175_v6  ;;  %v1295_v0 = vadd.f32 %v1294_v13, %v893_v55 }
 0x7fc   :  { %v1300_v7 = vsel %vm233_vm15, %v1295_v0, -inf }
 0x7fd   :  { %v2259_v29 = vpop.eup %1797 }
 0x7fe   :  { %v1172_v8 = vpop.f32.mrf.mxu2  ;;  %v943_v12 = vsel %vm233_vm15, %v2259_v29, 0.0 }
 0x7ff   :  { %v1173_v2 = vadd.f32 %v1172_v8, %v893_v55  ;;  %944 = vadd.xlane.f32.xlu0 %v943_v12 }
 0x801   :  { %v1178_v14 = vsel %vm233_vm15, %v1173_v2, -inf }
 0x802   :  { %1179 = vmax.xlane.f32.xlu1 %v1178_v14 }
 0x807   :  { %1301 = vmax.xlane.f32.xlu0 %v1300_v7 }
 0x80a   :  { %1298 = vmax.xlane.f32.xlu1 %v1297_v17 }
 0x823   :  { %1715 = vrot.lane.b32.xlu1 %v1714_v19, %s1864_s14 }
 0x857   :  { %v1055_v20 = vpop.xlane.xlu0 %1054 }
 0x858   :  { %v1059_v25 = vsub.f32 %v1048_v53, %v1055_v20 }
 0x85a   :  { %v1061_v28 = vmul.f32 1.442695, %v1059_v25 }
 0x85f   :  { %v936_v16 = vpop.xlane.xlu0 %935 }
 0x860   :  { %v1058_v21 = vpop.xlane.xlu2 %1057  ;;  %v938_v22 = vsub.f32 %v929_v56, %v936_v16 }
 0x861   :  { %v1060_v23 = vsub.f32 %v1051_v58, %v1058_v21 }
 0x862   :  { %v941_v26 = vmul.f32 1.442695, %v938_v22 }
 0x863   :  { %v1063_v27 = vmul.f32 1.442695, %v1060_v23 }
 0x864   :  { %1799 = vpow2.f32 %v941_v26 }
 0x865   :  { %1801 = vpow2.f32 %v1063_v27 }
 0x866   :  { %1803 = vpow2.f32 %v1061_v28 }
 0x86a   :  { %v2269_v30 = vpop.eup %1799 }
 0x86b   :  { %v2271_v24 = vpop.eup %1801  ;;  %v946_v11 = vsel %vm233_vm15, %v2269_v30, 0.0 }
 0x86c   :  { %947 = vadd.xlane.f32.xlu2 %v946_v11  ;;  %v1068_v31 = vsel %vm233_vm15, %v2271_v24, 0.0  ;;  %v2277_v33 = vpop.eup %1803 }
 0x86d   :  { %1069 = vadd.xlane.f32.xlu1 %v1068_v31  ;;  %v1177_v40 = vpop.xlane.xlu2 %1176  ;;  %v1065_v38 = vsel %vm233_vm15, %v2277_v33, 0.0 }
 0x86e   :  { %v1181_v32 = vsub.f32 %v1170_v4, %v1177_v40 }
 0x870   :  { %v1183_v34 = vmul.f32 1.442695, %v1181_v32 }
 0x872   :  { %1805 = vpow2.f32 %v1183_v34  ;;  %v2279_v35 = vpop.xlane.xlu0 %944 }
 0x873   :  { %vm954_vm5 = vweird.f32 %v2279_v35 }
 0x874   :  { %1066 = vadd.xlane.f32.xlu2 %v1065_v38 }
 0x875   :  { %v1180_v39 = vpop.xlane.xlu1 %1179 }
 0x876   :  { %v1182_v42 = vsub.f32 %v1173_v2, %v1180_v39 }
 0x878   :  { %v2283_v41 = vpop.eup %1805  ;;  %v1185_v44 = vmul.f32 1.442695, %v1182_v42 }
 0x879   :  { %v1187_v36 = vsel %vm233_vm15, %v2283_v41, 0.0 }
 0x87a   :  { %1807 = vpow2.f32 %v1185_v44  ;;  %v1302_v45 = vpop.xlane.xlu0 %1301 }
 0x87b   :  { %v1304_v37 = vsub.f32 %v1295_v0, %v1302_v45 }
 0x87c   :  { %1188 = vadd.xlane.f32.xlu2 %v1187_v36 }
 0x87d   :  { %v1307_v46 = vmul.f32 1.442695, %v1304_v37  ;;  %v1299_v47 = vpop.xlane.xlu1 %1298 }
 0x87e   :  { %v1303_v48 = vsub.f32 %v1292_v15, %v1299_v47 }
 0x87f   :  { %1809 = vpow2.f32 %v1307_v46 }
 0x880   :  { %v2287_v43 = vpop.eup %1807  ;;  %v1305_v49 = vmul.f32 1.442695, %v1303_v48 }
 0x881   :  { %v1190_v50 = vsel %vm233_vm15, %v2287_v43, 0.0 }
 0x882   :  { %1811 = vpow2.f32 %v1305_v49 }
 0x884   :  { %1191 = vadd.xlane.f32.xlu2 %v1190_v50 }
 0x885   :  { %v2292_v51 = vpop.eup %1809 }
 0x886   :  { %1725 = vrot.lane.b32.xlu1 %v1714_v19, %s1866_s16  ;;  %v1312_v54 = vsel %vm233_vm15, %v2292_v51, 0.0 }
 0x888   :  { %v2294_v52 = vpop.eup %1811 }
 0x889   :  { %v1309_v53 = vsel %vm233_vm15, %v2294_v52, 0.0 }
 0x88a   :  { %1310 = vadd.xlane.f32.xlu0 %v1309_v53 }
 0x88c   :  { %1313 = vadd.xlane.f32.xlu2 %v1312_v54 }
 0x895   :  { %v1716_v55 = vpop.permute.xlu1 %1715 }
 0x896   :  { %v1717_v18 = vunpack.i.l.bf16 %v1716_v55  ;;  %v1718_v56 = vunpack.i.h.bf16 %v1716_v55  ;;  %v960_v55 = vand.u32 2147483648, %v2279_v35 }
 0x898   :  { %1127 = vmatpush.msra.mxu3 %v1717_v18 }
 0x89a   :  { %1128 = vmatpush.msra.mxu3 %v1718_v56 }
 0x89e   :  { %1720 = vrot.lane.b32.xlu0 %v1714_v19, %s1865_s15 }
 0x8a4   :  { %1730 = vrot.lane.b32.xlu2 %v1714_v19, %s1867_s17 }
 0x8df   :  { %v2302_v57 = vpop.xlane.xlu2 %947 }
 0x8e0   :  { %v1070_v58 = vpop.xlane.xlu1 %1069 }
 0x8e1   :  { %1813 = vrcp.f32 %v1070_v58  ;;  %v1097_v16 = vand.u32 2147483648, %v1070_v58  ;;  %vm1091_vm13 = vweird.f32 %v1070_v58  ;;  %v1095_v23 = vand.u32 2147483647, %v1070_v58 }
 0x8e3   :  { %v1098_v28 = vor.u32 1.1754944e-38, %v1097_v16  ;;  %vm1096_vm2 = vcmp.eq.f32.partialorder %v1095_v23, 8.507059e+37 }
 0x8e7   :  { %v1067_v59 = vpop.xlane.xlu2 %1066  ;;  %v1814_v60 = vpop.eup %1813 }
 0x8e8   :  { %1815 = vrcp.f32 %v1067_v59  ;;  %v1087_v61 = vmul.f32 %v1814_v60, %v1070_v58  ;;  %v1082_v6 = vand.u32 2147483648, %v1067_v59  ;;  %v1080_v12 = vand.u32 2147483647, %v1067_v59 }
 0x8e9   :  { %1817 = vrcp.f32 %v2279_v35  ;;  %vm1076_vm9 = vweird.f32 %v1067_v59  ;;  %vm1092_vm12 = vweird.f32 %v1814_v60 }
 0x8ea   :  { %v1088_v3 = vsub.f32 1.0, %v1087_v61  ;;  %v1083_v14 = vor.u32 1.1754944e-38, %v1082_v6  ;;  %vm1081_vm11 = vcmp.eq.f32.partialorder %v1080_v12, 8.507059e+37  ;;  %vm1093_vm1 = vmor %vm1091_vm13, %vm1092_vm12  ;;  %1819 = vrcp.f32 %v2302_v57 }
 0x8ec   :  { %v1089_v13 = vmul.f32 %v1814_v60, %v1088_v3 }
 0x8ee   :  { %v1816_v62 = vpop.eup %1815  ;;  %v1090_v19 = vadd.f32 %v1814_v60, %v1089_v13 }
 0x8ef   :  { %v1072_v63 = vmul.f32 %v1816_v62, %v1067_v59  ;;  %v2304_v1 = vpop.xlane.xlu2 %1188  ;;  %vm1077_vm8 = vweird.f32 %v1816_v62  ;;  %v2309_v20 = vpop.eup %1817  ;;  %v958_v59 = vand.u32 2147483647, %v2279_v35 }
 0x8f0   :  { %vm1078_vm10 = vmor %vm1076_vm9, %vm1077_vm8  ;;  %v950_v26 = vmul.f32 %v2309_v20, %v2279_v35  ;;  %v1094_v27 = vsel %vm1093_vm1, %v1814_v60, %v1090_v19  ;;  %v2320_v34 = vpop.eup %1819  ;;  %vm955_vm3 = vweird.f32 %v2309_v20 }
 0x8f1   :  { %v1073_v4 = vsub.f32 1.0, %v1072_v63  ;;  %v1099_v40 = vsel %vm1096_vm2, %v1098_v28, %v1094_v27  ;;  %v965_v45 = vmul.f32 %v2320_v34, %v2302_v57  ;;  %vm2333_vm6 = vmor %vm954_vm5, %vm955_vm3  ;;  %vm959_vm13 = vcmp.eq.f32.partialorder %v958_v59, 8.507059e+37  ;;  %v56_v59 = vld [vmem:[%s2500_s3 + $0x50] sm:$0xff] }
 0x8f2   :  { %v951_v32 = vsub.f32 1.0, %v950_v26  ;;  %vm970_vm2 = vweird.f32 %v2320_v34  ;;  %v973_v26 = vand.u32 2147483647, %v2302_v57 }
 0x8f3   :  { %v1074_v8 = vmul.f32 %v1816_v62, %v1073_v4  ;;  %v966_v50 = vsub.f32 1.0, %v965_v45 }
 0x8f4   :  { %v952_v39 = vmul.f32 %v2309_v20, %v951_v32 }
 0x8f5   :  { %v1075_v2 = vadd.f32 %v1816_v62, %v1074_v8  ;;  %v967_v63 = vmul.f32 %v2320_v34, %v966_v50  ;;  %v961_v8 = vor.u32 1.1754944e-38, %v960_v55 }
 0x8f6   :  { %v953_v46 = vadd.f32 %v2309_v20, %v952_v39  ;;  %v1204_v39 = vand.u32 2147483648, %v2304_v1 }
 0x8f7   :  { %v1079_v0 = vsel %vm1078_vm10, %v1816_v62, %v1075_v2  ;;  %v2307_v15 = vpop.xlane.xlu2 %1191 }
 0x8f8   :  { %v1084_v7 = vsel %vm1081_vm11, %v1083_v14, %v1079_v0  ;;  %v1726_v17 = vpop.permute.xlu1 %1725  ;;  %v957_v58 = vsel %vm2333_vm6, %v2309_v20, %v953_v46  ;;  %vm974_vm6 = vcmp.eq.f32.partialorder %v973_v26, 8.507059e+37  ;;  %v1205_v45 = vor.u32 1.1754944e-38, %v1204_v39  ;;  %v59_v39 = vld [vmem:[%s2500_s3 + $0x28] sm:$0xff] }
 0x8f9   :  { %v1727_v21 = vunpack.i.l.bf16 %v1726_v17  ;;  %v1085_v22 = vmul.f32 %v2277_v33, %v1084_v7  ;;  %v1728_v25 = vunpack.i.h.bf16 %v1726_v17  ;;  %v1100_v33 = vmul.f32 %v2271_v24, %v1099_v40 }
 0x8fa   :  { %v962_v14 = vsel %vm959_vm13, %v961_v8, %v957_v58  ;;  %v1219_v46 = vand.u32 2147483648, %v2307_v15  ;;  %vm1213_vm13 = vweird.f32 %v2307_v15  ;;  %v57_v58 = vld [vmem:[%s2500_s3 + $0x80] sm:$0xff] }
 0x8fb   :  { %1371 = vmatpush.msrb.mxu3 %v1727_v21  ;;  %v975_v21 = vand.u32 2147483648, %v2302_v57  ;;  %v963_v23 = vmul.f32 %v2259_v29, %v962_v14 }
 0x8fc   :  { %1653 = vmatmul.msk.f32.vlgmr.msra.gmra.mxu3 %vm233_vm15, %v1085_v22 }
 0x8fd   :  { %1372 = vmatpush.msrb.mxu3 %v1728_v25  ;;  %v1311_v11 = vpop.xlane.xlu0 %1310  ;;  %v976_v40 = vor.u32 1.1754944e-38, %v975_v21 }
 0x8fe   :  { %1821 = vrcp.f32 %v1311_v11  ;;  %v1326_v24 = vand.u32 2147483648, %v1311_v11  ;;  %v1324_v48 = vand.u32 2147483647, %v1311_v11  ;;  %vm1320_vm8 = vweird.f32 %v1311_v11 }
 0x8ff   :  { %v2316_v31 = vpop.xlane.xlu2 %1313 }
 0x900   :  { %1823 = vrcp.f32 %v2316_v31  ;;  %v1327_v60 = vor.u32 1.1754944e-38, %v1326_v24  ;;  %vm1325_vm10 = vcmp.eq.f32.partialorder %v1324_v48, 8.507059e+37  ;;  %v1341_v6 = vand.u32 2147483648, %v2316_v31 }
 0x901   :  { %1825 = vrcp.f32 %v2304_v1  ;;  %vm1335_vm12 = vweird.f32 %v2316_v31  ;;  %v1339_v12 = vand.u32 2147483647, %v2316_v31 }
 0x902   :  { %1827 = vrcp.f32 %v2307_v15  ;;  %v1342_v20 = vor.u32 1.1754944e-38, %v1341_v6 }
 0x903   :  { %vm1340_vm3 = vcmp.eq.f32.partialorder %v1339_v12, 8.507059e+37 }
 0x904   :  { %v1822_v38 = vpop.eup %1821  ;;  %1654 = vmatmul.msk.f32.gmra.mxu3 %vm233_vm15, %v1100_v33 }
 0x905   :  { %v1316_v42 = vmul.f32 %v1822_v38, %v1311_v11  ;;  %vm1321_vm4 = vweird.f32 %v1822_v38 }
 0x906   :  { %v1824_v44 = vpop.eup %1823  ;;  %vm1322_vm9 = vmor %vm1320_vm8, %vm1321_vm4  ;;  %vm969_vm4 = vweird.f32 %v2302_v57 }
 0x907   :  { %v1317_v37 = vsub.f32 1.0, %v1316_v42  ;;  %v1331_v36 = vmul.f32 %v1824_v44, %v2316_v31  ;;  %v2331_v53 = vpop.eup %1825  ;;  %vm1336_vm11 = vweird.f32 %v1824_v44  ;;  %v1731_v16 = vpop.permute.xlu2 %1730  ;;  %vm971_vm5 = vmor %vm969_vm4, %vm970_vm2 }
 0x908   :  { %v1194_v3 = vmul.f32 %v2331_v53, %v2304_v1  ;;  %vm2350_vm1 = vmor %vm1335_vm12, %vm1336_vm11  ;;  %v1828_v17 = vpop.eup %1827  ;;  %v1732_v27 = vunpack.i.l.bf16 %v1731_v16  ;;  %v1733_v32 = vunpack.i.h.bf16 %v1731_v16  ;;  %vm1199_vm8 = vweird.f32 %v2331_v53 }
 0x909   :  { %v1318_v47 = vmul.f32 %v1822_v38, %v1317_v37  ;;  %v1332_v49 = vsub.f32 1.0, %v1331_v36  ;;  %v1209_v11 = vmul.f32 %v1828_v17, %v2307_v15  ;;  %vm1214_vm12 = vweird.f32 %v1828_v17 }
 0x90a   :  { %v1195_v19 = vsub.f32 1.0, %v1194_v3 }
 0x90b   :  { %v1319_v18 = vadd.f32 %v1822_v38, %v1318_v47  ;;  %v1333_v56 = vmul.f32 %v1824_v44, %v1332_v49  ;;  %v1220_v47 = vor.u32 1.1754944e-38, %v1219_v46 }
 0x90c   :  { %v1196_v28 = vmul.f32 %v2331_v53, %v1195_v19 }
 0x90d   :  { %v1323_v61 = vsel %vm1322_vm9, %v1822_v38, %v1319_v18  ;;  %v1334_v62 = vadd.f32 %v1824_v44, %v1333_v56  ;;  %v1210_v38 = vsub.f32 1.0, %v1209_v11  ;;  %vm1198_vm9 = vweird.f32 %v2304_v1  ;;  %v58_v56 = vld [vmem:[%s2500_s3 + $0xb0] sm:$0xff] }
 0x90e   :  { %v1328_v4 = vsel %vm1325_vm10, %v1327_v60, %v1323_v61  ;;  %v1197_v57 = vadd.f32 %v2331_v53, %v1196_v28  ;;  %vm1200_vm10 = vmor %vm1198_vm9, %vm1199_vm8  ;;  %1429 = vmatpush.msrb.mxu2 %v58_v56  ;;  %v55_v60 = vld [vmem:[%s2500_s3 + $0x20] sm:$0xff] }
 0x90f   :  { %v1329_v35 = vmul.f32 %v2294_v52, %v1328_v4  ;;  %v1338_v7 = vsel %vm2350_vm1, %v1824_v44, %v1334_v62  ;;  %v968_v52 = vadd.f32 %v2320_v34, %v967_v63  ;;  %v1211_v44 = vmul.f32 %v1828_v17, %v1210_v38  ;;  %vm1215_vm1 = vmor %vm1213_vm13, %vm1214_vm12 }
 0x910   :  { %v1721_v13 = vpop.permute.xlu0 %1720  ;;  %v1343_v25 = vsel %vm1340_vm3, %v1342_v20, %v1338_v7  ;;  %1430 = vmatpush.msrb.mxu2 %v57_v58  ;;  %v67_v58 = vld [vmem:[%s2501_s4 + $0x20] sm:$0xff]  ;;  %vm1556_vm13 = vcmask 523264  }
 0x911   :  { %v1722_v0 = vunpack.i.l.bf16 %v1721_v13  ;;  %1665 = vmatmul.msk.f32.vlgmr.msrb.gmra.mxu3 %vm233_vm15, %v1329_v35  ;;  %v1723_v22 = vunpack.i.h.bf16 %v1721_v13  ;;  %v972_v31 = vsel %vm971_vm5, %v2320_v34, %v968_v52  ;;  %v1344_v33 = vmul.f32 %v2292_v51, %v1343_v25 }
 0x912   :  { %v977_v29 = vsel %vm974_vm6, %v976_v40, %v972_v31  ;;  %v1202_v34 = vand.u32 2147483647, %v2304_v1  ;;  %v1201_v51 = vsel %vm1200_vm10, %v2331_v53, %v1197_v57  ;;  %v1212_v36 = vadd.f32 %v1828_v17, %v1211_v44  ;;  %1431 = vmatpush.msrb.mxu2 %v56_v59  ;;  %v60_v57 = vld [vmem:[%s2500_s3 + $0x58] sm:$0xff] }
 0x913   :  { %1005 = vmatpush.msrb.mxu0 %v1722_v0  ;;  %v978_v42 = vmul.f32 %v2269_v30, %v977_v29  ;;  %v1217_v1 = vand.u32 2147483647, %v2307_v15  ;;  %v1742_v0 = vld [vmem:[%s2502_s5 + $0x4] ss:$0 sm:$0xff]  ;;  %v62_v29 = vld [vmem:[%s2500_s3 + $0xb8] sm:$0xff] }
 0x914   :  { %vm1203_vm11 = vcmp.eq.f32.partialorder %v1202_v34, 8.507059e+37  ;;  %v1216_v30 = vsel %vm1215_vm1, %v1828_v17, %v1212_v36  ;;  %1432 = vmatpush.msrb.mxu2 %v55_v60 }
 0x915   :  { %1006 = vmatpush.msrb.mxu0 %v1723_v22  ;;  %v1206_v37 = vsel %vm1203_vm11, %v1205_v45, %v1201_v51  ;;  %vm1218_vm2 = vcmp.eq.f32.partialorder %v1217_v1, 8.507059e+37 }
 0x916   :  { %1647 = vmatmul.msk.f32.vlgmr.msrb.gmra.mxu0 %vm233_vm15, %v963_v23  ;;  %v1207_v24 = vmul.f32 %v2283_v41, %v1206_v37  ;;  %v1221_v48 = vsel %vm1218_vm2, %v1220_v47, %v1216_v30 }
 0x917   :  { %1249 = vmatpush.msra.mxu0 %v1732_v27  ;;  %v1222_v49 = vmul.f32 %v2287_v43, %v1221_v48 }
 0x919   :  { %1250 = vmatpush.msra.mxu0 %v1733_v32  ;;  %1666 = vmatmul.msk.f32.gmra.mxu3 %vm233_vm15, %v1344_v33 }
 0x91b   :  { %1543 = vmatpush.msrb.mxu0 %v62_v29  ;;  %v65_v29 = vld [vmem:[%s2501_s4 + $0x10] sm:$0xff] }
 0x91e   :  { %1648 = vmatmul.msk.f32.gmra.mxu0 %vm233_vm15, %v978_v42 }
 0x926   :  { %1659 = vmatmul.msk.f32.vlgmr.msra.gmra.mxu0 %vm233_vm15, %v1207_v24 }
 0x92e   :  { %1660 = vmatmul.msk.f32.gmra.mxu0 %vm233_vm15, %v1222_v49 }
 0x97f   :  { %v1130_v50 = vpop.f32.mrf.mxu3 }
 0x980   :  { %1382 = vrot.lane.b32.xlu0 %v1130_v50, %s1876_s28 }
 0x987   :  { %v1133_v53 = vpop.f32.mrf.mxu3 }
 0x993   :  { %v1008_v54 = vpop.f32.mrf.mxu0 }
 0x994   :  { %v1374_v55 = vpop.f32.mrf.mxu3 }
 0x995   :  { %1398 = vrot.lane.b32.xlu0 %v1374_v55, %s1877_s29  ;;  %v69_v55 = vld [vmem:[%s2501_s4 + $0x30] sm:$0xff] }
 0x99b   :  { %v1011_v41 = vpop.f32.mrf.mxu0 }
 0x99c   :  { %v1377_v43 = vpop.f32.mrf.mxu3 }
 0x9a3   :  { %v1252_v15 = vpop.f32.mrf.mxu0 }
 0x9a4   :  { %1390 = vrot.lane.b32.xlu1 %v1252_v15, %s1875_s27 }
 0x9ab   :  { %v1255_v18 = vpop.f32.mrf.mxu0 }
 0x9ac   :  { %1384 = vrot.lane.b32.xlu1 %v1133_v53, %s1876_s28  ;;  %1392 = vrot.lane.b32.xlu0 %v1255_v18, %s1875_s27  ;;  %v68_v18 = vld [vmem:[%s2501_s4 + $0x28] sm:$0xff] }
 0x9b4   :  { %1400 = vrot.lane.b32.xlu1 %v1377_v43, %s1877_s29 }
 0x9f2   :  { %v1383_v61 = vpop.permute.xlu0 %1382 }
 0x9f3   :  { %v1404_v62 = vsel %vm201_vm14, %v1008_v54, %v1383_v61  ;;  %v70_v54 = vld [vmem:[%s2501_s4 + $0x38] sm:$0xff] }
 0x9f4   :  { %1571 = vmatpush.msrb.mxu1 %v70_v54 }
 0x9f6   :  { %1572 = vmatpush.msrb.mxu1 %v69_v55 }
 0x9f8   :  { %1573 = vmatpush.msrb.mxu1 %v68_v18 }
 0x9fa   :  { %1574 = vmatpush.msrb.mxu1 %v67_v58 }
 0xa07   :  { %v1399_v3 = vpop.permute.xlu0 %1398 }
 0xa16   :  { %v1391_v63 = vpop.permute.xlu1 %1390 }
 0xa17   :  { %v1406_v4 = vsel %vm233_vm15, %v1404_v62, %v1391_v63  ;;  %v66_v63 = vld [vmem:[%s2501_s4 + $0x18] sm:$0xff] }
 0xa18   :  { %v1408_v6 = vsel %vm711_vm7, %v1406_v4, %v1399_v3  ;;  %v1743_v3 = vld [vmem:[%s2502_s5 + $0x9] ss:$0 sm:$0xff]  ;;  %1575 = vmatpush.msrb.mxu1 %v66_v63 }
 0xa19   :  { %1667 = vmatmul.msk.f32.vlgmr.msrb.gmra.mxu2 %vm75_vm0, %v1408_v6 }
 0xa1a   :  { %1576 = vmatpush.msrb.mxu1 %v65_v29 }
 0xa1e   :  { %v1385_v8 = vpop.permute.xlu1 %1384  ;;  %v1393_v12 = vpop.permute.xlu0 %1392 }
 0xa1f   :  { %v1405_v35 = vsel %vm201_vm14, %v1011_v41, %v1385_v8 }
 0xa20   :  { %v1407_v13 = vsel %vm233_vm15, %v1405_v35, %v1393_v12 }
 0xa26   :  { %v1401_v2 = vpop.permute.xlu1 %1400 }
 0xa27   :  { %v1409_v14 = vsel %vm711_vm7, %v1407_v13, %v1401_v2 }
 0xa28   :  { %1668 = vmatmul.msk.f32.gmra.mxu2 %vm75_vm0, %v1409_v14 }
 0xa9c   :  { %v1434_v7 = vpop.f32.mrf.mxu2 }
 0xa9d   :  { %v1435_v17 = vadd.f32 %v1742_v0, %v1434_v7  ;;  %v1744_v7 = vld [vmem:[%s2502_s5 + $0xc] ss:$0 sm:$0xff] }
 0xa9f   :  { %v2414_v19 = vadd.f32 %v1435_v17, %v2139_v5 }
 0xaa1   :  { %v1442_v20 = vsel %vm75_vm0, %v2414_v19, 0.0 }
 0xaa2   :  { %1443 = vadd.xlane.f32.xlu2 %v1442_v20 }
 0xaab   :  { %v1437_v16 = vpop.f32.mrf.mxu2 }
 0xaac   :  { %v1438_v52 = vadd.f32 %v1742_v0, %v1437_v16 }
 0xaae   :  { %v2419_v21 = vadd.f32 %v1438_v52, %v2144_v9 }
 0xab0   :  { %v1445_v22 = vsel %vm75_vm0, %v2419_v21, 0.0 }
 0xab1   :  { %1446 = vadd.xlane.f32.xlu0 %v1445_v22 }
 0xb15   :  { %v1444_v23 = vpop.xlane.xlu2 %1443 }
 0xb16   :  { %v1448_v25 = vmul.f32 %v1444_v23, %v1929_v10 }
 0xb18   :  { %v2425_v26 = vsub.f32 %v2414_v19, %v1448_v25 }
 0xb1a   :  { %v1452_v5 = vmul.f32 %v2425_v26, %v2425_v26  ;;  %v1463_v14 = vmul.f32 %v1743_v3, %v2425_v26 }
 0xb1c   :  { %v1454_v27 = vsel %vm75_vm0, %v1452_v5, 0.0 }
 0xb1d   :  { %1455 = vadd.xlane.f32.xlu1 %v1454_v27 }
 0xb24   :  { %v1447_v28 = vpop.xlane.xlu0 %1446 }
 0xb25   :  { %v1449_v9 = vmul.f32 %v1447_v28, %v1929_v10  ;;  %v61_v10 = vld [vmem:[%s2500_s3 + $0x88] sm:$0xff]  ;;  %s1597_s3 = sshll.u32 %s1878_s0, 4  ;;  %s1598_s3 = int_to_ptr.vmem [resolvable:$true] %s1597_s3 }
 0xb26   :  { %1544 = vmatpush.msrb.mxu0 %v61_v10  ;;  %v64_v10 = vld [vmem:[%s2501_s4 + $0x8] sm:$0xff] }
 0xb27   :  { %v2432_v11 = vsub.f32 %v2419_v21, %v1449_v9  ;;  %1577 = vmatpush.msrb.mxu1 %v64_v10 }
 0xb28   :  { %1545 = vmatpush.msrb.mxu0 %v60_v57  ;;  %v1745_v57 = vld [vmem:[%s2502_s5 + $0x5] ss:$0 sm:$0xff] }
 0xb29   :  { %v1453_v31 = vmul.f32 %v2432_v11, %v2432_v11  ;;  %v1464_v9 = vmul.f32 %v1743_v3, %v2432_v11  ;;  %v63_v11 = vld [vmem:[%s2501_s4] sm:$0xff] }
 0xb2a   :  { %1546 = vmatpush.msrb.mxu0 %v59_v39  ;;  %1578 = vmatpush.msrb.mxu1 %v63_v11 }
 0xb2b   :  { %v1457_v40 = vsel %vm75_vm0, %v1453_v31, 0.0 }
 0xb2c   :  { %1458 = vadd.xlane.f32.xlu2 %v1457_v40 }
 0xb90   :  { %v1456_v32 = vpop.xlane.xlu1 %1455 }
 0xb91   :  { %v1460_v33 = vmul.f32 0.032258064, %v1456_v32 }
 0xb93   :  { %1829 = vrsqrt.f32 %v1460_v33  ;;  %vm1472_vm14 = vcmp.eq.f32.partialorder %v1460_v33, inf  ;;  %v1475_v24 = vand.u32 2147483648, %v1460_v33  ;;  %vm1474_vm15 = vcmp.eq.f32.partialorder %v1460_v33, 0.0 }
 0xb99   :  { %v1830_v38 = vpop.eup %1829 }
 0xb9a   :  { %v1466_v34 = vmul.f32 %v1830_v38, %v1460_v33 }
 0xb9c   :  { %v1467_v42 = vmul.f32 %v1830_v38, %v1466_v34 }
 0xb9e   :  { %v1468_v51 = vmul.f32 0.5, %v1467_v42 }
 0xb9f   :  { %v1459_v44 = vpop.xlane.xlu2 %1458 }
 0xba0   :  { %v1469_v45 = vsub.f32 1.5, %v1468_v51  ;;  %v1461_v37 = vmul.f32 0.032258064, %v1459_v44 }
 0xba2   :  { %v1470_v36 = vmul.f32 %v1830_v38, %v1469_v45  ;;  %1831 = vrsqrt.f32 %v1461_v37  ;;  %vm1484_vm7 = vcmp.eq.f32.partialorder %v1461_v37, inf  ;;  %vm1486_vm3 = vcmp.eq.f32.partialorder %v1461_v37, 0.0  ;;  %v1746_v45 = vld [vmem:[%s2502_s5 + $0x6] ss:$0 sm:$0xff]  ;;  %s1879_s5 = smov 128  }
 0xba3   :  { %v1487_v61 = vand.u32 2147483648, %v1461_v37 }
 0xba4   :  { %v1471_v46 = vmul.f32 %v1470_v36, %v1460_v33 }
 0xba6   :  { %v1473_v1 = vsel %vm1472_vm14, %v1460_v33, %v1471_v46 }
 0xba7   :  { %v1476_v30 = vsel %vm1474_vm15, %v1475_v24, %v1473_v1 }
 0xba8   :  { %v1832_v47 = vpop.eup %1831  ;;  %v1489_v48 = vadd.f32 1e-06, %v1476_v30 }
 0xba9   :  { %v1478_v49 = vmul.f32 %v1832_v47, %v1461_v37 }
 0xbaa   :  { %1833 = vrcp.f32 %v1489_v48  ;;  %v1502_v62 = vand.u32 2147483648, %v1489_v48  ;;  %v1500_v8 = vand.u32 2147483647, %v1489_v48  ;;  %vm1496_vm5 = vweird.f32 %v1489_v48 }
 0xbab   :  { %v1479_v50 = vmul.f32 %v1832_v47, %v1478_v49 }
 0xbac   :  { %v1503_v2 = vor.u32 1.1754944e-38, %v1502_v62  ;;  %vm1501_vm8 = vcmp.eq.f32.partialorder %v1500_v8, 8.507059e+37 }
 0xbad   :  { %v1480_v53 = vmul.f32 0.5, %v1479_v50 }
 0xbaf   :  { %v1481_v41 = vsub.f32 1.5, %v1480_v53 }
 0xbb0   :  { %v1834_v15 = vpop.eup %1833 }
 0xbb1   :  { %v1482_v43 = vmul.f32 %v1832_v47, %v1481_v41  ;;  %v1492_v56 = vmul.f32 %v1834_v15, %v1489_v48  ;;  %vm1497_vm4 = vweird.f32 %v1834_v15 }
 0xbb2   :  { %vm1498_vm6 = vmor %vm1496_vm5, %vm1497_vm4 }
 0xbb3   :  { %v1483_v59 = vmul.f32 %v1482_v43, %v1461_v37  ;;  %v1493_v60 = vsub.f32 1.0, %v1492_v56 }
 0xbb5   :  { %v1485_v4 = vsel %vm1484_vm7, %v1461_v37, %v1483_v59  ;;  %v1494_v6 = vmul.f32 %v1834_v15, %v1493_v60 }
 0xbb6   :  { %v1488_v35 = vsel %vm1486_vm3, %v1487_v61, %v1485_v4 }
 0xbb7   :  { %v1495_v12 = vadd.f32 %v1834_v15, %v1494_v6  ;;  %v1490_v13 = vadd.f32 1e-06, %v1488_v35 }
 0xbb9   :  { %v1499_v0 = vsel %vm1498_vm6, %v1834_v15, %v1495_v12  ;;  %1835 = vrcp.f32 %v1490_v13  ;;  %v1517_v25 = vand.u32 2147483648, %v1490_v13  ;;  %v1515_v27 = vand.u32 2147483647, %v1490_v13 }
 0xbba   :  { %v1504_v17 = vsel %vm1501_vm8, %v1503_v2, %v1499_v0  ;;  %vm1511_vm10 = vweird.f32 %v1490_v13 }
 0xbbb   :  { %v1505_v20 = vmul.f32 %v1504_v17, %v1463_v14  ;;  %v1518_v28 = vor.u32 1.1754944e-38, %v1517_v25  ;;  %vm1516_vm12 = vcmp.eq.f32.partialorder %v1515_v27, 8.507059e+37 }
 0xbbd   :  { %v1522_v16 = vadd.f32 %v1744_v7, %v1505_v20 }
 0xbbf   :  { %v1836_v52 = vpop.eup %1835  ;;  %1669 = vmatmul.msk.f32.vlgmr.msrb.gmra.mxu0 %vm75_vm0, %v1522_v16 }
 0xbc0   :  { %v1507_v22 = vmul.f32 %v1836_v52, %v1490_v13  ;;  %vm1512_vm9 = vweird.f32 %v1836_v52 }
 0xbc1   :  { %vm1513_vm11 = vmor %vm1511_vm10, %vm1512_vm9 }
 0xbc2   :  { %v1508_v23 = vsub.f32 1.0, %v1507_v22 }
 0xbc4   :  { %v1509_v5 = vmul.f32 %v1836_v52, %v1508_v23 }
 0xbc6   :  { %v1510_v26 = vadd.f32 %v1836_v52, %v1509_v5 }
 0xbc8   :  { %v1514_v31 = vsel %vm1513_vm11, %v1836_v52, %v1510_v26 }
 0xbc9   :  { %v1519_v40 = vsel %vm1516_vm12, %v1518_v28, %v1514_v31 }
 0xbca   :  { %v1520_v32 = vmul.f32 %v1519_v40, %v1464_v9 }
 0xbcc   :  { %v1523_v33 = vadd.f32 %v1744_v7, %v1520_v32 }
 0xbce   :  { %1670 = vmatmul.msk.f32.gmra.mxu0 %vm75_vm0, %v1523_v33 }
 0xc3c   :  { %v1548_v38 = vpop.f32.mrf.mxu0 }
 0xc3d   :  { %v1549_v39 = vadd.f32 %v1745_v57, %v1548_v38 }
 0xc3f   :  { %v1554_v34 = vmax.f32 %v1549_v39, 0.0 }
 0xc41   :  { %1671 = vmatmul.msk.f32.vlgmr.msrb.gmra.mxu1 %vm1556_vm13, %v1554_v34 }
 0xc4b   :  { %v1551_v42 = vpop.f32.mrf.mxu0 }
 0xc4c   :  { %v1552_v51 = vadd.f32 %v1745_v57, %v1551_v42 }
 0xc4e   :  { %v1555_v44 = vmax.f32 %v1552_v51, 0.0 }
 0xc50   :  { %1672 = vmatmul.msk.f32.gmra.mxu1 %vm1556_vm13, %v1555_v44 }
 0xcbe   :  { %v1580_v37 = vpop.f32.mrf.mxu1 }
 0xcbf   :  { %v1586_v36 = vadd.f32 %v1580_v37, %v2414_v19 }
 0xcc1   :  { %v1589_v46 = vadd.f32 %v1746_v45, %v1586_v36 }
 0xcc3   :  { %1591 = vst.msk [vmem:[#allocation2] sm:$0xff] %vm75_vm0, %v1589_v46 }
 0xccd   :  { %v1583_v24 = vpop.f32.mrf.mxu1 }
 0xcce   :  { %v1587_v1 = vadd.f32 %v1583_v24, %v2419_v21 }
 0xcd0   :  { %v1590_v30 = vadd.f32 %v1746_v45, %v1587_v1 }
 0xcd2   :  { %1592 = vst.msk [vmem:[#allocation2 + $0x8] sm:$0xff] %vm75_vm0, %v1590_v30 }
 0xcd3   :  { %1605 = dma.vmem_to_hbm [thread:$0]  %s1598_s3, 256, %s1600_s2, [#allocation3], %s1879_s5, %s1879_s5, %s1876_s28  }
 0xcd4   :  { %1861 = dma.done.wait [#allocation3], 256  }
 0xcd5   :  { %1862 = vsyncadd [#allocation3], 4294967040 }
 0xcd6   :  { %1610 = vsyncpa [#allocation3], 1 }

</bundles_post_ra>
